<compile_context>
chip_gen: v7x
topology: tpu7x:2x2x1
jax: 0.10.0
libtpu: 0.0.40
codegen_flags: <defaults>
</compile_context>

<pallas_src>
from functools import partial

import jax
import jax.numpy as jnp
from jax.experimental import pallas as pl
from jax.experimental.pallas import tpu as pltpu


_TB_MAX = 512     # batch-tile cap (multiple of 8 sublanes, f32)
_TH_MAX = 1024    # pair-tile cap (multiple of 128 lanes), output stays lane-dense


def _round_up(n: int, m: int) -> int:
    return ((n + m - 1) // m) * m


def _tiles(bs: int, half: int):
    """Pick aligned tile sizes that balance padding vs per-step overhead."""
    b_al = _round_up(bs, 8)
    h_al = _round_up(half, 128)
    nb = pl.cdiv(b_al, _TB_MAX)
    nh = pl.cdiv(h_al, _TH_MAX)
    tb = _round_up(pl.cdiv(b_al, nb), 8)
    th = _round_up(pl.cdiv(h_al, nh), 128)
    return tb, th


# ----------------------------------------------------------------------------
# Kernels
# ----------------------------------------------------------------------------
def _fused_kernel(x_ref, w_ref, o_ref):
    # x_ref: (tb, 2*th) contiguous slab, w_ref: (1, 2*th) interleaved weights,
    # o_ref: (tb, th).  Pair reduction happens in-register (XLU/VPU), hidden
    # under the tile DMA.
    tb, two_th = x_ref.shape
    y = x_ref[...] * w_ref[...]                       # VPU FMA-ish, f32
    o_ref[...] = jnp.sum(y.reshape(tb, two_th // 2, 2), axis=-1).astype(o_ref.dtype)


def _split_kernel(xe_ref, xo_ref, w_ref, o_ref):
    # Fallback path: xe/xo: (tb, th) pre-split even/odd columns, w_ref: (2, th).
    w = w_ref[...]
    o_ref[...] = (xe_ref[...] * w[0:1, :] + xo_ref[...] * w[1:2, :]).astype(o_ref.dtype)


# ----------------------------------------------------------------------------
# pallas_call wrappers
# ----------------------------------------------------------------------------
@partial(jax.jit, static_argnames=("tb", "th", "fused"))
def _forward(x, weight, *, tb, th, fused):
    bs, dim = x.shape
    half = dim // 2

    b_pad = _round_up(bs, tb)
    h_pad = _round_up(half, th)
    grid = (b_pad // tb, h_pad // th)

    cparams = pltpu.CompilerParams(
        dimension_semantics=("parallel", "parallel"),   # no reduction axis; lets
        vmem_limit_bytes=32 * 1024 * 1024,              # v7x use both TCs
    )
    out_shape = jax.ShapeDtypeStruct((b_pad, h_pad), x.dtype)
    out_spec = pl.BlockSpec((tb, th), lambda i, j: (i, j))

    # Zero-pad to exact tile multiples (no-op for aligned shapes).
    xp = jnp.pad(x, ((0, b_pad - bs), (0, 2 * h_pad - dim)))

    if fused:
        # Interleaved weights: w_il[2p] = w[p, 0], w_il[2p+1] = w[p, 1].
        w_il = jnp.pad(weight.reshape(1, dim), ((0, 0), (0, 2 * h_pad - dim)))
        out = pl.pallas_call(
            _fused_kernel,
            out_shape=out_shape,
            grid=grid,
            in_specs=[
                pl.BlockSpec((tb, 2 * th), lambda i, j: (i, j)),
                pl.BlockSpec((1, 2 * th), lambda i, j: (0, j)),
            ],
            out_specs=out_spec,
            compiler_params=cparams,
        )(xp, w_il)
    else:
        # Fallback: pre-split even/odd columns in XLA (extra HBM round trip, but
        # guaranteed to lower) and keep the same tiled, pipelined structure.
        xe = xp[:, 0::2]
        xo = xp[:, 1::2]
        w2 = jnp.pad(weight.T, ((0, 0), (0, h_pad - half)))      # (2, h_pad)
        out = pl.pallas_call(
            _split_kernel,
            out_shape=out_shape,
            grid=grid,
            in_specs=[
                pl.BlockSpec((tb, th), lambda i, j: (i, j)),
                pl.BlockSpec((tb, th), lambda i, j: (i, j)),
                pl.BlockSpec((2, th), lambda i, j: (0, j)),
            ],
            out_specs=out_spec,
            compiler_params=cparams,
        )(xe, xo, w2)

    return out[:bs, :half]


# One-time probe per tile configuration: the fused kernel's in-kernel pair
# reduction relies on a minor-dim reshape; verify it compiles AND matches a
# pure-JAX reference on this toolchain, otherwise use the split fallback.
_FUSED_OK_CACHE = {}


def _fused_supported(tb: int, th: int) -> bool:
    key = (tb, th)
    if key not in _FUSED_OK_CACHE:
        ok = False
        try:
            bs_p, half_p = tb, th
            xp = (jnp.arange(bs_p * 2 * half_p, dtype=jnp.float32)
                  .reshape(bs_p, 2 * half_p) % 37.0) * 0.25 - 2.0
            wp = (jnp.arange(half_p * 2, dtype=jnp.float32)
                  .reshape(half_p, 2) % 5.0) * 0.125
            got = _forward(xp, wp, tb=tb, th=th, fused=True)
            ref = jnp.sum(xp.reshape(bs_p, half_p, 2) * wp[None, :, :], axis=-1)
            ok = bool(jnp.allclose(got, ref, atol=1e-5, rtol=1e-5))
        except Exception:   # Mosaic lowering/compile failure -> fallback path
            ok = False
        _FUSED_OK_CACHE[key] = ok
    return _FUSED_OK_CACHE[key]


def pair_linear_halve(x: jax.Array, weight: jax.Array) -> jax.Array:
    """x: (bs, dim), weight: (dim//2, 2) -> (bs, dim//2)."""
    bs, dim = x.shape
    assert dim % 2 == 0, "Input dim must be even number"
    half = dim // 2
    assert weight.shape == (half, 2)
    tb, th = _tiles(bs, half)
    return _forward(x, weight, tb=tb, th=th, fused=_fused_supported(tb, th))


if __name__ == "__main__":
    key = jax.random.PRNGKey(0)
    bs, input_dim = 2, 32

    x = jax.random.normal(key, (bs, input_dim), dtype=jnp.float32)
    # Deterministic init matching PairLinearHalve.__init__: every pair -> [0.5, 0.5]
    weight = jnp.full((input_dim // 2, 2), 0.5, dtype=jnp.float32)

    out = jax.block_until_ready(pair_linear_halve(x, weight))
    ref = jnp.sum(x.reshape(bs, -1, 2) * weight[None, :, :], axis=-1)
    assert out.shape == (bs, input_dim // 2)
    assert jnp.allclose(out, ref, atol=1e-6, rtol=1e-6)

    # Multi-tile check (2x2 grid, random weights) to exercise the tiled path.
    x2 = jax.random.normal(jax.random.PRNGKey(1), (16, 512), dtype=jnp.float32)
    w2 = jax.random.normal(jax.random.PRNGKey(2), (256, 2), dtype=jnp.float32)
    out2 = jax.block_until_ready(
        _forward(x2, w2, tb=8, th=128, fused=_fused_supported(8, 128)))
    ref2 = jnp.sum(x2.reshape(16, -1, 2) * w2[None, :, :], axis=-1)
    assert jnp.allclose(out2, ref2, atol=1e-5, rtol=1e-5)

    print("KERNEL_OK")
</pallas_src>

<mosaic_0001>
module attributes {stable_mosaic.version = 11 : i64} {
  func.func @_fused_kernel(%arg0: i32, %arg1: i32, %arg2: memref<8x256xf32, #tpu.memory_space<vmem>>, %arg3: memref<1x256xf32, #tpu.memory_space<vmem>>, %arg4: memref<8x128xf32, #tpu.memory_space<vmem>>) attributes {dimension_semantics = [#tpu.dimension_semantics<parallel>, #tpu.dimension_semantics<parallel>], iteration_bounds = array<i64: 1, 1>, scalar_prefetch = 0 : i64, scratch_operands = 0 : i64, tpu.core_type = #tpu.core_type<tc>, window_params = [{transform_indices = @transform_0, window_bounds = array<i64: 8, 256>}, {transform_indices = @transform_1, window_bounds = array<i64: 1, 256>}, {transform_indices = @transform_2, window_bounds = array<i64: 8, 128>}]} {
    %c0 = arith.constant 0 : index
    %c0_0 = arith.constant 0 : index
    %0 = vector.load %arg2[%c0, %c0_0] : memref<8x256xf32, #tpu.memory_space<vmem>>, vector<8x256xf32>
    %c0_1 = arith.constant 0 : index
    %c0_2 = arith.constant 0 : index
    %1 = vector.load %arg3[%c0_1, %c0_2] : memref<1x256xf32, #tpu.memory_space<vmem>>, vector<1x256xf32>
    %2 = vector.broadcast %1 : vector<1x256xf32> to vector<8x256xf32>
    %3 = arith.mulf %0, %2 : vector<8x256xf32>
    %4 = vector.shape_cast %3 : vector<8x256xf32> to vector<8x128x2xf32>
    %cst = arith.constant dense<0.000000e+00> : vector<8x128xf32>
    %5 = vector.multi_reduction <add>, %4, %cst [2] : vector<8x128x2xf32> to vector<8x128xf32>
    %c0_3 = arith.constant 0 : index
    %c0_4 = arith.constant 0 : index
    %6 = vector.load %arg4[%c0_3, %c0_4] : memref<8x128xf32, #tpu.memory_space<vmem>>, vector<8x128xf32>
    tpu.vector_store %arg4[%c0_3, %c0_4], %5 {strides = array<i32>} : memref<8x128xf32, #tpu.memory_space<vmem>>, vector<8x128xf32>,
    return
  }
  func.func @transform_0(%arg0: i32, %arg1: i32) -> (i32, i32) {
    %c0_i32 = arith.constant 0 : i32
    return %arg0, %arg1 : i32, i32
  }
  func.func @transform_1(%arg0: i32, %arg1: i32) -> (i32, i32) {
    %c0_i32 = arith.constant 0 : i32
    %c0_i32_0 = arith.constant 0 : i32
    return %c0_i32, %arg1 : i32, i32
  }
  func.func @transform_2(%arg0: i32, %arg1: i32) -> (i32, i32) {
    %c0_i32 = arith.constant 0 : i32
    return %arg0, %arg1 : i32, i32
  }
}

module attributes {stable_mosaic.version = 11 : i64} {
  func.func @_split_kernel(%arg0: i32, %arg1: i32, %arg2: memref<8x128xf32, #tpu.memory_space<vmem>>, %arg3: memref<8x128xf32, #tpu.memory_space<vmem>>, %arg4: memref<2x128xf32, #tpu.memory_space<vmem>>, %arg5: memref<8x128xf32, #tpu.memory_space<vmem>>) attributes {dimension_semantics = [#tpu.dimension_semantics<parallel>, #tpu.dimension_semantics<parallel>], iteration_bounds = array<i64: 1, 1>, scalar_prefetch = 0 : i64, scratch_operands = 0 : i64, tpu.core_type = #tpu.core_type<tc>, window_params = [{transform_indices = @transform_0, window_bounds = array<i64: 8, 128>}, {transform_indices = @transform_1, window_bounds = array<i64: 8, 128>}, {transform_indices = @transform_2, window_bounds = array<i64: 2, 128>}, {transform_indices = @transform_3, window_bounds = array<i64: 8, 128>}]} {
    %c0 = arith.constant 0 : index
    %c0_0 = arith.constant 0 : index
    %0 = vector.load %arg4[%c0, %c0_0] : memref<2x128xf32, #tpu.memory_space<vmem>>, vector<2x128xf32>
    %c0_1 = arith.constant 0 : index
    %c0_2 = arith.constant 0 : index
    %1 = vector.load %arg2[%c0_1, %c0_2] : memref<8x128xf32, #tpu.memory_space<vmem>>, vector<8x128xf32>
    %2 = vector.extract_strided_slice %0 {offsets = [0, 0], sizes = [1, 128], strides = [1, 1]} : vector<2x128xf32> to vector<1x128xf32>
    %3 = vector.broadcast %2 : vector<1x128xf32> to vector<8x128xf32>
    %4 = arith.mulf %1, %3 : vector<8x128xf32>
    %c0_3 = arith.constant 0 : index
    %c0_4 = arith.constant 0 : index
    %5 = vector.load %arg3[%c0_3, %c0_4] : memref<8x128xf32, #tpu.memory_space<vmem>>, vector<8x128xf32>
    %6 = vector.extract_strided_slice %0 {offsets = [1, 0], sizes = [1, 128], strides = [1, 1]} : vector<2x128xf32> to vector<1x128xf32>
    %7 = vector.broadcast %6 : vector<1x128xf32> to vector<8x128xf32>
    %8 = arith.mulf %5, %7 : vector<8x128xf32>
    %9 = arith.addf %4, %8 : vector<8x128xf32>
    %c0_5 = arith.constant 0 : index
    %c0_6 = arith.constant 0 : index
    %10 = vector.load %arg5[%c0_5, %c0_6] : memref<8x128xf32, #tpu.memory_space<vmem>>, vector<8x128xf32>
    tpu.vector_store %arg5[%c0_5, %c0_6], %9 {strides = array<i32>} : memref<8x128xf32, #tpu.memory_space<vmem>>, vector<8x128xf32>,
    return
  }
  func.func @transform_0(%arg0: i32, %arg1: i32) -> (i32, i32) {
    %c0_i32 = arith.constant 0 : i32
    return %arg0, %arg1 : i32, i32
  }
  func.func @transform_1(%arg0: i32, %arg1: i32) -> (i32, i32) {
    %c0_i32 = arith.constant 0 : i32
    return %arg0, %arg1 : i32, i32
  }
  func.func @transform_2(%arg0: i32, %arg1: i32) -> (i32, i32) {
    %c0_i32 = arith.constant 0 : i32
    %c0_i32_0 = arith.constant 0 : i32
    return %c0_i32, %arg1 : i32, i32
  }
  func.func @transform_3(%arg0: i32, %arg1: i32) -> (i32, i32) {
    %c0_i32 = arith.constant 0 : i32
    return %arg0, %arg1 : i32, i32
  }
}

</mosaic_0001>

<bundles_post_ra>
// kernel: _forward.1
= control target key start
LH: loop header
LB: loop body
LE: loop exit
PB: predicated region body
PF: predicated region fallthrough
CT: control target
= control target key end

     0   :  { %v6157_v0 = vlaneseq  ;;  %s6119_s0 = inlined_call_operand.vmem [shape: f32[8,256], index: 0, kind: input, shape index: {}]   ;;  %s6120_s1 = inlined_call_operand.vmem [shape: f32[1,256], index: 1, kind: input, shape index: {}]   ;;  %s6121_s2 = inlined_call_operand.hbm [shape: f32[8,128], index: 2, kind: output, shape index: {}]  }
   0x2   :  { %v3963_v1 = vshrl.u32 %v6157_v0, 7 }
   0x4   :  { %6335 = vst [vmem:[#allocation5_spill] sm:$0xff] %v3963_v1 }
   0x5   :  { %7 = vsyncpa [#allocation3], 0  ;;  %v3968_v2 = vld [vmem:[%s6120_s1] sm:$0x3]  ;;  %v18_v3 = vsub.s32 0, %v3963_v1  ;;  %s3881_s13 = smov 122  }
   0x6   :  { %v12_v4 = vld [vmem:[%s6119_s0] sm:$0xff]  ;;  %s3882_s14 = smov 126   ;;  %s3883_s1 = smov 120   ;;  %v3937_v7 = vmov 1983009808   ;;  %v22_v9 = vsub.s32 1, %v3963_v1 }
   0x7   :  { %v19_v5 = vrot.slane %v3968_v2, %v18_v3  ;;  %s3884_s15 = smov 124   ;;  %s3885_s16 = smov 116   ;;  %v411_v8 = vunpack.c.l.s4 %v3937_v7  ;;  %v13_v16 = vld [vmem:[%s6119_s0 + $0x8] sm:$0xff]  ;;  %v3944_v23 = vmov 1934713408   ;;  %vm2584_vm0 = vcmask 15360  }
   0x8   :  { %s3886_s17 = smov 118   ;;  %s3887_s18 = smov 112   ;;  %v23_v13 = vrot.slane %v3968_v2, %v22_v9  ;;  %v475_v24 = vunpack.c.l.s4 %v3944_v23  ;;  %vm3108_vm1 = vcmask 130112   ;;  %vm3115_vm2 = vcmask 195712  }
   0x9   :  { %v3975_v6 = vmul.f32 %v19_v5, %v12_v4  ;;  %s3888_s19 = smov 114   ;;  %s3889_s20 = smov 108   ;;  %v412_v10 = vunpack.c.0.s8 %v411_v8  ;;  %vm3122_vm3 = vcmask 261312   ;;  %vm3129_vm4 = vcmask 326912  }
   0xa   :  { %s3890_s21 = smov 110   ;;  %s3891_s22 = smov 104   ;;  %v4121_v20 = vmul.f32 %v23_v13, %v13_v16  ;;  %v476_v29 = vunpack.c.0.s8 %v475_v24  ;;  %vm3136_vm5 = vcmask 392512   ;;  %vm3143_vm6 = vcmask 458112  }
   0xb   :  { %6336 = vst [vmem:[#allocation6_spill] sm:$0xff] %v3975_v6  ;;  %35 = vrot.lane.b32.xlu1 %v3975_v6, %s3881_s13  ;;  %29 = vrot.lane.b32.xlu0 %v3975_v6, %s3882_s14  ;;  %s3892_s23 = smov 106   ;;  %s3893_s24 = smov 100   ;;  %v4104_v14 = vsub.s32 %v412_v10, %v3963_v1  ;;  %vm3150_vm7 = vcmask 523712   ;;  %vm3157_vm8 = vcmask 589312   ;;  %vm3164_vm9 = vcmask 654912  }
   0xc   :  { %s3894_s25 = smov 102   ;;  %s3895_s26 = smov 96   ;;  %v4148_v36 = vsub.s32 %v476_v29, %v3963_v1  ;;  %vm3171_vm10 = vcmask 720512   ;;  %vm3178_vm11 = vcmask 786112   ;;  %vm6334_vm12 = vcmask 851712  }
   0xd   :  { %s3896_s27 = smov 98   ;;  %s3897_s28 = smov 92   ;;  %vm3192_vm13 = vcmask 917312   ;;  %vm3199_vm14 = vcmask 982912   ;;  %vm3206_vm15 = vcmask 1048512  }
   0xe   :  { %s3898_s29 = smov 94   ;;  %s3899_s30 = smov 88  }
   0xf   :  { %38 = vrot.lane.b32.xlu1 %v3975_v6, %s3883_s1  ;;  %32 = vrot.lane.b32.xlu0 %v3975_v6, %s3884_s15  ;;  %s3900_s3 = smov 90   ;;  %s3901_s4 = smov 84  }
  0x10   :  { %s3902_s5 = smov 86   ;;  %s6122_s6 = smov 80  }
  0x11   :  { %s3904_s7 = smov 82   ;;  %s6123_s8 = smov 76  }
  0x12   :  { %s6124_s9 = smov 78   ;;  %s6125_s10 = smov 72  }
  0x13   :  { %44 = vrot.lane.b32.xlu1 %v3975_v6, %s3885_s16  ;;  %41 = vrot.lane.b32.xlu0 %v3975_v6, %s3886_s17  ;;  %s6126_s11 = smov 74   ;;  %s6127_s12 = smov 68  }
  0x14   :  { %s3945_s0 = smov 2  }
  0x17   :  { %50 = vrot.lane.b32.xlu1 %v3975_v6, %s3887_s18  ;;  %47 = vrot.lane.b32.xlu0 %v3975_v6, %s3888_s19 }
  0x1b   :  { %56 = vrot.lane.b32.xlu1 %v3975_v6, %s3889_s20  ;;  %53 = vrot.lane.b32.xlu0 %v3975_v6, %s3890_s21 }
  0x1f   :  { %62 = vrot.lane.b32.xlu1 %v3975_v6, %s3891_s22  ;;  %59 = vrot.lane.b32.xlu0 %v3975_v6, %s3892_s23 }
  0x23   :  { %68 = vrot.lane.b32.xlu1 %v3975_v6, %s3893_s24  ;;  %65 = vrot.lane.b32.xlu0 %v3975_v6, %s3894_s25 }
  0x27   :  { %74 = vrot.lane.b32.xlu1 %v3975_v6, %s3895_s26  ;;  %71 = vrot.lane.b32.xlu0 %v3975_v6, %s3896_s27 }
  0x2b   :  { %80 = vrot.lane.b32.xlu1 %v3975_v6, %s3897_s28  ;;  %77 = vrot.lane.b32.xlu0 %v3975_v6, %s3898_s29 }
  0x2f   :  { %86 = vrot.lane.b32.xlu1 %v3975_v6, %s3899_s30  ;;  %83 = vrot.lane.b32.xlu0 %v3975_v6, %s3900_s3 }
  0x33   :  { %92 = vrot.lane.b32.xlu1 %v3975_v6, %s3901_s4  ;;  %89 = vrot.lane.b32.xlu0 %v3975_v6, %s3902_s5 }
  0x37   :  { %98 = vrot.lane.b32.xlu1 %v3975_v6, %s6122_s6  ;;  %95 = vrot.lane.b32.xlu0 %v3975_v6, %s3904_s7  ;;  %s6128_s6 = smov 70  }
  0x3b   :  { %104 = vrot.lane.b32.xlu1 %v3975_v6, %s6123_s8  ;;  %101 = vrot.lane.b32.xlu0 %v3975_v6, %s6124_s9  ;;  %s6129_s8 = smov 64   ;;  %s6130_s9 = smov 66  }
  0x3f   :  { %110 = vrot.lane.b32.xlu1 %v3975_v6, %s6125_s10  ;;  %107 = vrot.lane.b32.xlu0 %v3975_v6, %s6126_s11  ;;  %s6131_s10 = smov 60   ;;  %s6132_s11 = smov 62  }
  0x43   :  { %116 = vrot.lane.b32.xlu1 %v3975_v6, %s6127_s12  ;;  %113 = vrot.lane.b32.xlu0 %v3975_v6, %s6128_s6  ;;  %s6133_s12 = smov 56   ;;  %s6134_s6 = smov 58  }
  0x47   :  { %122 = vrot.lane.b32.xlu1 %v3975_v6, %s6129_s8  ;;  %119 = vrot.lane.b32.xlu0 %v3975_v6, %s6130_s9  ;;  %s6135_s8 = smov 52   ;;  %s6136_s9 = smov 54  }
  0x4b   :  { %128 = vrot.lane.b32.xlu1 %v3975_v6, %s6131_s10  ;;  %125 = vrot.lane.b32.xlu0 %v3975_v6, %s6132_s11  ;;  %s6137_s10 = smov 48   ;;  %s6138_s11 = smov 50  }
  0x4f   :  { %134 = vrot.lane.b32.xlu1 %v3975_v6, %s6133_s12  ;;  %131 = vrot.lane.b32.xlu0 %v3975_v6, %s6134_s6  ;;  %s6139_s12 = smov 44   ;;  %s6140_s6 = smov 46  }
  0x53   :  { %140 = vrot.lane.b32.xlu1 %v3975_v6, %s6135_s8  ;;  %137 = vrot.lane.b32.xlu0 %v3975_v6, %s6136_s9  ;;  %s6141_s8 = smov 40   ;;  %s6142_s9 = smov 42  }
  0x57   :  { %146 = vrot.lane.b32.xlu1 %v3975_v6, %s6137_s10  ;;  %143 = vrot.lane.b32.xlu0 %v3975_v6, %s6138_s11  ;;  %s6143_s10 = smov 36   ;;  %s6144_s11 = smov 38  }
  0x5b   :  { %152 = vrot.lane.b32.xlu1 %v3975_v6, %s6139_s12  ;;  %149 = vrot.lane.b32.xlu0 %v3975_v6, %s6140_s6  ;;  %s6145_s12 = smov 32   ;;  %s6146_s6 = smov 34  }
  0x5f   :  { %158 = vrot.lane.b32.xlu1 %v3975_v6, %s6141_s8  ;;  %155 = vrot.lane.b32.xlu0 %v3975_v6, %s6142_s9  ;;  %s6147_s8 = smov 28   ;;  %s6148_s9 = smov 30  }
  0x63   :  { %164 = vrot.lane.b32.xlu1 %v3975_v6, %s6143_s10  ;;  %161 = vrot.lane.b32.xlu0 %v3975_v6, %s6144_s11  ;;  %s6149_s10 = smov 24   ;;  %s6150_s11 = smov 26  }
  0x67   :  { %170 = vrot.lane.b32.xlu1 %v3975_v6, %s6145_s12  ;;  %167 = vrot.lane.b32.xlu0 %v3975_v6, %s6146_s6  ;;  %s6152_s12 = smov 20   ;;  %s3934_s6 = smov 22  }
  0x6b   :  { %176 = vrot.lane.b32.xlu1 %v3975_v6, %s6147_s8  ;;  %173 = vrot.lane.b32.xlu0 %v3975_v6, %s6148_s9  ;;  %s6151_s8 = smov 16   ;;  %s3936_s9 = smov 18  }
  0x6f   :  { %182 = vrot.lane.b32.xlu1 %v3975_v6, %s6149_s10  ;;  %179 = vrot.lane.b32.xlu0 %v3975_v6, %s6150_s11  ;;  %s6153_s10 = smov 12   ;;  %s6154_s11 = smov 14  }
  0x73   :  { %188 = vrot.lane.b32.xlu1 %v3975_v6, %s6152_s12  ;;  %185 = vrot.lane.b32.xlu0 %v3975_v6, %s3934_s6  ;;  %s6156_s12 = smov 10  }
  0x77   :  { %194 = vrot.lane.b32.xlu1 %v3975_v6, %s6151_s8  ;;  %191 = vrot.lane.b32.xlu0 %v3975_v6, %s3936_s9  ;;  %s6155_s8 = smov 8  }
  0x7b   :  { %200 = vrot.lane.b32.xlu1 %v3975_v6, %s6153_s10  ;;  %197 = vrot.lane.b32.xlu0 %v3975_v6, %s6154_s11  ;;  %s6411_s10 = smov 36   ;;  %s6412_s11 = smov 30  }
  0x7d   :  { %v4094_v11 = vpop.permute.xlu1 %35  ;;  %v4096_v12 = vpop.permute.xlu0 %29 }
  0x7e   :  { %6337 = vst [vmem:[#allocation7_spill] sm:$0xff] %v4094_v11  ;;  %6338 = vst [vmem:[#allocation8_spill] sm:$0xff] %v4096_v12  ;;  %v424_v15 = vcombine.low %v4096_v12, %v4094_v11 }
  0x7f   :  { %206 = vrot.lane.b32.xlu1 %v3975_v6, %s6155_s8  ;;  %203 = vrot.lane.b32.xlu0 %v3975_v6, %s6156_s12  ;;  %s3942_s8 = smov 4   ;;  %s3943_s12 = smov 6  }
  0x80   :  { %v432_v21 = vrot.slane %v424_v15, %v4104_v14 }
  0x81   :  { %v4111_v17 = vpop.permute.xlu1 %38  ;;  %v4113_v18 = vpop.permute.xlu0 %32 }
  0x82   :  { %6339 = vst [vmem:[#allocation9_spill] sm:$0xff] %v4111_v17  ;;  %6340 = vst [vmem:[#allocation10_spill] sm:$0xff] %v4113_v18  ;;  %v408_v19 = vcombine.low %v3975_v6, %v4113_v18 }
  0x83   :  { %212 = vrot.lane.b32.xlu1 %v3975_v6, %s3942_s8  ;;  %209 = vrot.lane.b32.xlu0 %v3975_v6, %s3943_s12 }
  0x84   :  { %v416_v22 = vrot.slane %v408_v19, %v4104_v14 }
  0x85   :  { %v4125_v25 = vpop.permute.xlu1 %44  ;;  %v4127_v26 = vpop.permute.xlu0 %41 }
  0x86   :  { %6341 = vst [vmem:[#allocation11_spill] sm:$0xff] %v4125_v25  ;;  %6342 = vst [vmem:[#allocation12_spill] sm:$0xff] %v4127_v26  ;;  %v473_v27 = vcombine.high %v416_v22, %v432_v21  ;;  %v440_v28 = vcombine.low %v4111_v17, %v4125_v25  ;;  %v472_v33 = vcombine.low %v416_v22, %v432_v21 }
  0x87   :  { %219 = vrot.lane.b32.xlu1 %v4121_v20, %s3882_s14  ;;  %215 = vrot.lane.b32.xlu0 %v3975_v6, %s3945_s0  ;;  %s6370_s14 = smov 80  }
  0x88   :  { %v448_v34 = vrot.slane %v440_v28, %v4104_v14  ;;  %v4161_v42 = vrot.slane %v472_v33, %v4148_v36  ;;  %v4174_v47 = vrot.slane %v473_v27, %v4148_v36 }
  0x89   :  { %v4135_v30 = vpop.permute.xlu1 %50  ;;  %v4137_v31 = vpop.permute.xlu0 %47 }
  0x8a   :  { %6343 = vst [vmem:[#allocation13_spill] sm:$0xff] %v4135_v30  ;;  %6344 = vst [vmem:[#allocation14_spill] sm:$0xff] %v4137_v31  ;;  %v456_v32 = vcombine.low %v4127_v26, %v4137_v31 }
  0x8b   :  { %225 = vrot.lane.b32.xlu1 %v4121_v20, %s3881_s13  ;;  %222 = vrot.lane.b32.xlu0 %v4121_v20, %s3884_s15  ;;  %s6369_s13 = smov 78   ;;  %s6373_s15 = smov 76  }
  0x8c   :  { %v464_v35 = vrot.slane %v456_v32, %v4104_v14 }
  0x8d   :  { %v4150_v37 = vpop.permute.xlu1 %56  ;;  %v4152_v38 = vpop.permute.xlu0 %53 }
  0x8e   :  { %6345 = vst [vmem:[#allocation15_spill] sm:$0xff] %v4150_v37  ;;  %6346 = vst [vmem:[#allocation16_spill] sm:$0xff] %v4152_v38  ;;  %v504_v39 = vcombine.low %v448_v34, %v464_v35  ;;  %v505_v40 = vcombine.high %v448_v34, %v464_v35  ;;  %v544_v41 = vcombine.low %v4135_v30, %v4150_v37 }
  0x8f   :  { %231 = vrot.lane.b32.xlu1 %v4121_v20, %s3886_s17  ;;  %228 = vrot.lane.b32.xlu0 %v4121_v20, %s3883_s1  ;;  %s6372_s1 = smov 74   ;;  %s6375_s17 = smov 72  }
  0x90   :  { %v4164_v43 = vrot.slane %v504_v39, %v4148_v36  ;;  %v4167_v44 = vrot.slane %v505_v40, %v4148_v36  ;;  %v552_v52 = vrot.slane %v544_v41, %v4104_v14 }
  0x91   :  { %v4169_v45 = vpop.permute.xlu1 %62  ;;  %v4171_v46 = vpop.permute.xlu0 %59 }
  0x92   :  { %6347 = vst [vmem:[#allocation17_spill] sm:$0xff] %v4169_v45  ;;  %6348 = vst [vmem:[#allocation18_spill] sm:$0xff] %v4171_v46  ;;  %v560_v48 = vcombine.low %v4152_v38, %v4171_v46 }
  0x93   :  { %237 = vrot.lane.b32.xlu1 %v4121_v20, %s3888_s19  ;;  %234 = vrot.lane.b32.xlu0 %v4121_v20, %s3885_s16  ;;  %s6374_s16 = smov 70   ;;  %s6379_s19 = smov 68  }
  0x94   :  { %v568_v53 = vrot.slane %v560_v48, %v4104_v14 }
  0x95   :  { %v4190_v54 = vpop.permute.xlu1 %68  ;;  %v4192_v55 = vpop.permute.xlu0 %65 }
  0x96   :  { %6349 = vst [vmem:[#allocation19_spill] sm:$0xff] %v4190_v54  ;;  %6350 = vst [vmem:[#allocation20_spill] sm:$0xff] %v4192_v55  ;;  %v609_v56 = vcombine.high %v552_v52, %v568_v53  ;;  %v576_v57 = vcombine.low %v4169_v45, %v4190_v54  ;;  %v608_v61 = vcombine.low %v552_v52, %v568_v53 }
  0x97   :  { %243 = vrot.lane.b32.xlu1 %v4121_v20, %s3890_s21  ;;  %240 = vrot.lane.b32.xlu0 %v4121_v20, %s3887_s18  ;;  %s6378_s18 = smov 66   ;;  %s6383_s21 = smov 64  }
  0x98   :  { %v584_v62 = vrot.slane %v576_v57, %v4104_v14  ;;  %v4223_v8 = vrot.slane %v608_v61, %v4148_v36  ;;  %v4236_v16 = vrot.slane %v609_v56, %v4148_v36 }
  0x99   :  { %v4200_v58 = vpop.permute.xlu1 %74  ;;  %v4202_v59 = vpop.permute.xlu0 %71 }
  0x9a   :  { %6351 = vst [vmem:[#allocation21_spill] sm:$0xff] %v4200_v58  ;;  %6352 = vst [vmem:[#allocation22_spill] sm:$0xff] %v4202_v59  ;;  %v592_v60 = vcombine.low %v4192_v55, %v4202_v59 }
  0x9b   :  { %249 = vrot.lane.b32.xlu1 %v4121_v20, %s3892_s23  ;;  %246 = vrot.lane.b32.xlu0 %v4121_v20, %s3889_s20  ;;  %6358 = vst [vmem:[#allocation28_spill] sm:$0xff] %v4236_v16  ;;  %s6382_s20 = smov 62   ;;  %s6386_s23 = smov 60  }
  0x9c   :  { %v600_v63 = vrot.slane %v592_v60, %v4104_v14 }
  0x9d   :  { %v4212_v2 = vpop.permute.xlu1 %80  ;;  %v4214_v3 = vpop.permute.xlu0 %77 }
  0x9e   :  { %6353 = vst [vmem:[#allocation23_spill] sm:$0xff] %v4212_v2  ;;  %6354 = vst [vmem:[#allocation24_spill] sm:$0xff] %v4214_v3  ;;  %v640_v4 = vcombine.low %v584_v62, %v600_v63  ;;  %v641_v5 = vcombine.high %v584_v62, %v600_v63  ;;  %v680_v7 = vcombine.low %v4200_v58, %v4212_v2 }
  0x9f   :  { %255 = vrot.lane.b32.xlu1 %v4121_v20, %s3894_s25  ;;  %252 = vrot.lane.b32.xlu0 %v4121_v20, %s3891_s22  ;;  %s6385_s22 = smov 58   ;;  %s6392_s25 = smov 56  }
  0xa0   :  { %v4226_v9 = vrot.slane %v640_v4, %v4148_v36  ;;  %v4229_v10 = vrot.slane %v641_v5, %v4148_v36  ;;  %v688_v24 = vrot.slane %v680_v7, %v4104_v14 }
  0xa1   :  { %v4231_v13 = vpop.permute.xlu1 %86  ;;  %v4233_v15 = vpop.permute.xlu0 %83 }
  0xa2   :  { %6355 = vst [vmem:[#allocation25_spill] sm:$0xff] %v4229_v10  ;;  %6356 = vst [vmem:[#allocation26_spill] sm:$0xff] %v4231_v13  ;;  %v696_v19 = vcombine.low %v4214_v3, %v4233_v15 }
  0xa3   :  { %6357 = vst [vmem:[#allocation27_spill] sm:$0xff] %v4233_v15  ;;  %261 = vrot.lane.b32.xlu1 %v4121_v20, %s3896_s27  ;;  %258 = vrot.lane.b32.xlu0 %v4121_v20, %s3893_s24  ;;  %s6391_s24 = smov 54   ;;  %s6396_s27 = smov 52  }
  0xa4   :  { %v704_v27 = vrot.slane %v696_v19, %v4104_v14 }
  0xa5   :  { %v4252_v28 = vpop.permute.xlu1 %92  ;;  %v4254_v29 = vpop.permute.xlu0 %89 }
  0xa6   :  { %6359 = vst [vmem:[#allocation29_spill] sm:$0xff] %v4252_v28  ;;  %6360 = vst [vmem:[#allocation30_spill] sm:$0xff] %v4254_v29  ;;  %v745_v32 = vcombine.high %v688_v24, %v704_v27  ;;  %v712_v33 = vcombine.low %v4231_v13, %v4252_v28  ;;  %v744_v40 = vcombine.low %v688_v24, %v704_v27 }
  0xa7   :  { %267 = vrot.lane.b32.xlu1 %v4121_v20, %s3898_s29  ;;  %264 = vrot.lane.b32.xlu0 %v4121_v20, %s3895_s26  ;;  %s6395_s26 = smov 50   ;;  %s6402_s29 = smov 48  }
  0xa8   :  { %v720_v41 = vrot.slane %v712_v33, %v4104_v14  ;;  %v4285_v61 = vrot.slane %v744_v40, %v4148_v36  ;;  %v4298_v7 = vrot.slane %v745_v32, %v4148_v36 }
  0xa9   :  { %v4262_v34 = vpop.permute.xlu1 %98  ;;  %v4264_v35 = vpop.permute.xlu0 %95 }
  0xaa   :  { %6361 = vst [vmem:[#allocation31_spill] sm:$0xff] %v4262_v34  ;;  %6362 = vst [vmem:[#allocation32_spill] sm:$0xff] %v4264_v35  ;;  %v728_v39 = vcombine.low %v4254_v29, %v4264_v35 }
  0xab   :  { %273 = vrot.lane.b32.xlu1 %v4121_v20, %s3900_s3  ;;  %270 = vrot.lane.b32.xlu0 %v4121_v20, %s3897_s28  ;;  %s6401_s28 = smov 46   ;;  %s6405_s3 = smov 44  }
  0xac   :  { %v736_v48 = vrot.slane %v728_v39, %v4104_v14 }
  0xad   :  { %v4274_v52 = vpop.permute.xlu1 %104  ;;  %v4276_v53 = vpop.permute.xlu0 %101 }
  0xae   :  { %6363 = vst [vmem:[#allocation33_spill] sm:$0xff] %v4274_v52  ;;  %6364 = vst [vmem:[#allocation34_spill] sm:$0xff] %v4276_v53  ;;  %v776_v56 = vcombine.low %v720_v41, %v736_v48  ;;  %v777_v57 = vcombine.high %v720_v41, %v736_v48  ;;  %v816_v60 = vcombine.low %v4262_v34, %v4274_v52 }
  0xaf   :  { %279 = vrot.lane.b32.xlu1 %v4121_v20, %s3902_s5  ;;  %276 = vrot.lane.b32.xlu0 %v4121_v20, %s3899_s30  ;;  %s6404_s30 = smov 42   ;;  %s6407_s5 = smov 40  }
  0xb0   :  { %v4288_v62 = vrot.slane %v776_v56, %v4148_v36  ;;  %v4291_v63 = vrot.slane %v777_v57, %v4148_v36  ;;  %v824_v32 = vrot.slane %v816_v60, %v4104_v14 }
  0xb1   :  { %v4293_v4 = vpop.permute.xlu1 %110  ;;  %v4295_v5 = vpop.permute.xlu0 %107 }
  0xb2   :  { %6365 = vst [vmem:[#allocation35_spill] sm:$0xff] %v4293_v4  ;;  %6366 = vst [vmem:[#allocation36_spill] sm:$0xff] %v4295_v5  ;;  %v832_v19 = vcombine.low %v4276_v53, %v4295_v5 }
  0xb3   :  { %285 = vrot.lane.b32.xlu1 %v4121_v20, %s3904_s7  ;;  %282 = vrot.lane.b32.xlu0 %v4121_v20, %s3901_s4  ;;  %s6406_s4 = smov 38   ;;  %s6410_s7 = smov 34  }
  0xb4   :  { %v840_v39 = vrot.slane %v832_v19, %v4104_v14 }
  0xb5   :  { %v4314_v40 = vpop.permute.xlu1 %116  ;;  %v4316_v41 = vpop.permute.xlu0 %113 }
  0xb6   :  { %6367 = vst [vmem:[#allocation37_spill] sm:$0xff] %v4314_v40  ;;  %6368 = vst [vmem:[#allocation38_spill] sm:$0xff] %v4316_v41  ;;  %v881_v48 = vcombine.high %v824_v32, %v840_v39  ;;  %v848_v56 = vcombine.low %v4293_v4, %v4314_v40  ;;  %v880_v19 = vcombine.low %v824_v32, %v840_v39 }
  0xb7   :  { %291 = vrot.lane.b32.xlu1 %v4121_v20, %s6369_s13  ;;  %288 = vrot.lane.b32.xlu0 %v4121_v20, %s6370_s14  ;;  %s6413_s13 = smov 32   ;;  %s6415_s14 = smov 26  }
  0xb8   :  { %v856_v23 = vrot.slane %v848_v56, %v4104_v14  ;;  %v4339_v32 = vrot.slane %v880_v19, %v4148_v36 }
  0xb9   :  { %v123_v57 = vpop.permute.xlu1 %122  ;;  %v4324_v0 = vpop.permute.xlu0 %119 }
  0xba   :  { %6371 = vst [vmem:[#allocation39_spill] sm:$0xff] %v4324_v0  ;;  %v864_v60 = vcombine.low %v4316_v41, %v4324_v0 }
  0xbb   :  { %297 = vrot.lane.b32.xlu1 %v4121_v20, %s6372_s1  ;;  %294 = vrot.lane.b32.xlu0 %v4121_v20, %s6373_s15  ;;  %s6416_s1 = smov 28   ;;  %s6419_s15 = smov 24  }
  0xbc   :  { %v872_v33 = vrot.slane %v864_v60, %v4104_v14 }
  0xbd   :  { %v129_v51 = vpop.permute.xlu1 %128  ;;  %v126_v22 = vpop.permute.xlu0 %125 }
  0xbe   :  { %v912_v27 = vcombine.low %v856_v23, %v872_v33  ;;  %v913_v50 = vcombine.high %v856_v23, %v872_v33  ;;  %v952_v39 = vcombine.low %v123_v57, %v129_v51  ;;  %v953_v21 = vcombine.high %v123_v57, %v129_v51 }
  0xbf   :  { %303 = vrot.lane.b32.xlu1 %v4121_v20, %s6374_s16  ;;  %300 = vrot.lane.b32.xlu0 %v4121_v20, %s6375_s17  ;;  %v4348_v23 = vrot.slane %v881_v48, %v4148_v36  ;;  %s6432_s16 = smov 16   ;;  %s6434_s17 = smov 10  }
  0xc0   :  { %v4342_v24 = vrot.slane %v912_v27, %v4148_v36  ;;  %v4345_v56 = vrot.slane %v913_v50, %v4148_v36  ;;  %v960_v27 = vrot.slane %v952_v39, %v4104_v14  ;;  %v4362_v48 = vrot.slane %v953_v21, %v4104_v14 }
  0xc1   :  { %v135_v60 = vpop.permute.xlu1 %134  ;;  %v132_v49 = vpop.permute.xlu0 %131  ;;  %6377 = vst [vmem:[#allocation41_spill] sm:$0xff] %v4348_v23 }
  0xc2   :  { %6376 = vst [vmem:[#allocation40_spill] sm:$0xff] %v4345_v56  ;;  %v968_v33 = vcombine.low %v126_v22, %v132_v49  ;;  %v969_v1 = vcombine.high %v126_v22, %v132_v49  ;;  %6380 = vst [vmem:[#allocation42_spill] sm:$0xff] %v4362_v48 }
  0xc3   :  { %309 = vrot.lane.b32.xlu1 %v4121_v20, %s6378_s18  ;;  %306 = vrot.lane.b32.xlu0 %v4121_v20, %s6379_s19  ;;  %s6435_s18 = smov 12   ;;  %s6436_s19 = smov 8  }
  0xc4   :  { %v976_v49 = vrot.slane %v968_v33, %v4104_v14  ;;  %v4366_v22 = vrot.slane %v969_v1, %v4104_v14 }
  0xc5   :  { %v141_v57 = vpop.permute.xlu1 %140  ;;  %v138_v19 = vpop.permute.xlu0 %137 }
  0xc6   :  { %6381 = vst [vmem:[#allocation43_spill] sm:$0xff] %v4366_v22  ;;  %v1017_v4 = vcombine.high %v960_v27, %v976_v49  ;;  %v1033_v40 = vcombine.high %v4362_v48, %v4366_v22  ;;  %v984_v39 = vcombine.low %v135_v60, %v141_v57  ;;  %v985_v21 = vcombine.high %v135_v60, %v141_v57 }
  0xc7   :  { %315 = vrot.lane.b32.xlu1 %v4121_v20, %s6382_s20  ;;  %312 = vrot.lane.b32.xlu0 %v4121_v20, %s6383_s21  ;;  %v1016_v34 = vcombine.low %v960_v27, %v976_v49 }
  0xc8   :  { %v992_v52 = vrot.slane %v984_v39, %v4104_v14  ;;  %v4382_v48 = vrot.slane %v985_v21, %v4104_v14  ;;  %v4414_v41 = vrot.slane %v1017_v4, %v4148_v36 }
  0xc9   :  { %v4374_v51 = vpop.permute.xlu1 %146  ;;  %v144_v33 = vpop.permute.xlu0 %143  ;;  %v4401_v39 = vrot.slane %v1016_v34, %v4148_v36 }
  0xca   :  { %6384 = vst [vmem:[#allocation44_spill] sm:$0xff] %v4374_v51  ;;  %v1000_v50 = vcombine.low %v138_v19, %v144_v33  ;;  %v1001_v1 = vcombine.high %v138_v19, %v144_v33  ;;  %6387 = vst [vmem:[#allocation45_spill] sm:$0xff] %v4382_v48 }
  0xcb   :  { %321 = vrot.lane.b32.xlu1 %v4121_v20, %s6385_s22  ;;  %318 = vrot.lane.b32.xlu0 %v4121_v20, %s6386_s23 }
  0xcc   :  { %v1008_v22 = vrot.slane %v1000_v50, %v4104_v14  ;;  %v4386_v60 = vrot.slane %v1001_v1, %v4104_v14 }
  0xcd   :  { %v4388_v57 = vpop.permute.xlu1 %152  ;;  %v4390_v19 = vpop.permute.xlu0 %149 }
  0xce   :  { %6388 = vst [vmem:[#allocation46_spill] sm:$0xff] %v4386_v60  ;;  %6389 = vst [vmem:[#allocation47_spill] sm:$0xff] %v4388_v57  ;;  %v1048_v27 = vcombine.low %v992_v52, %v1008_v22  ;;  %v1049_v49 = vcombine.high %v992_v52, %v1008_v22  ;;  %v1065_v33 = vcombine.high %v4382_v48, %v4386_v60 }
  0xcf   :  { %6390 = vst [vmem:[#allocation48_spill] sm:$0xff] %v4390_v19  ;;  %327 = vrot.lane.b32.xlu1 %v4121_v20, %s6391_s24  ;;  %324 = vrot.lane.b32.xlu0 %v4121_v20, %s6392_s25  ;;  %v1088_v50 = vcombine.low %v4374_v51, %v4388_v57 }
  0xd0   :  { %v4404_v21 = vrot.slane %v1048_v27, %v4148_v36  ;;  %v4407_v52 = vrot.slane %v1049_v49, %v4148_v36  ;;  %v4429_v4 = vrot.slane %v1065_v33, %v4148_v36 }
  0xd1   :  { %v4409_v22 = vpop.permute.xlu1 %158  ;;  %v4411_v1 = vpop.permute.xlu0 %155  ;;  %v1096_v51 = vrot.slane %v1088_v50, %v4104_v14 }
  0xd2   :  { %6393 = vst [vmem:[#allocation49_spill] sm:$0xff] %v4409_v22  ;;  %6394 = vst [vmem:[#allocation50_spill] sm:$0xff] %v4411_v1  ;;  %v1104_v0 = vcombine.low %v4390_v19, %v4411_v1  ;;  %v4438_v1 = vrot.slane %v1033_v40, %v4148_v36  ;;  %v1080_v25 = vcombine.low %v4401_v39, %v4404_v21 }
  0xd3   :  { %333 = vrot.lane.b32.xlu1 %v4121_v20, %s6395_s26  ;;  %330 = vrot.lane.b32.xlu0 %v4121_v20, %s6396_s27  ;;  %6397 = vst [vmem:[#allocation51_spill] sm:$0xff] %v4429_v4 }
  0xd4   :  { %v1112_v57 = vrot.slane %v1104_v0, %v4104_v14  ;;  %6400 = vst [vmem:[#allocation54_spill] sm:$0xff] %v4438_v1 }
  0xd5   :  { %v4433_v34 = vpop.permute.xlu1 %164  ;;  %v4435_v19 = vpop.permute.xlu0 %161 }
  0xd6   :  { %6398 = vst [vmem:[#allocation52_spill] sm:$0xff] %v4433_v34  ;;  %6399 = vst [vmem:[#allocation53_spill] sm:$0xff] %v4435_v19  ;;  %v1153_v53 = vcombine.high %v1096_v51, %v1112_v57  ;;  %v1120_v0 = vcombine.low %v4409_v22, %v4433_v34  ;;  %v1152_v5 = vcombine.low %v1096_v51, %v1112_v57 }
  0xd7   :  { %339 = vrot.lane.b32.xlu1 %v4121_v20, %s6401_s28  ;;  %336 = vrot.lane.b32.xlu0 %v4121_v20, %s6402_s29 }
  0xd8   :  { %v1128_v33 = vrot.slane %v1120_v0, %v4104_v14  ;;  %v4465_v51 = vrot.slane %v1152_v5, %v4148_v36 }
  0xd9   :  { %v171_v50 = vpop.permute.xlu1 %170  ;;  %v4448_v49 = vpop.permute.xlu0 %167 }
  0xda   :  { %6403 = vst [vmem:[#allocation55_spill] sm:$0xff] %v4448_v49  ;;  %v1136_v27 = vcombine.low %v4435_v19, %v4448_v49 }
  0xdb   :  { %345 = vrot.lane.b32.xlu1 %v4121_v20, %s6404_s30  ;;  %342 = vrot.lane.b32.xlu0 %v4121_v20, %s6405_s3 }
  0xdc   :  { %v1144_v22 = vrot.slane %v1136_v27, %v4104_v14 }
  0xdd   :  { %v177_v34 = vpop.permute.xlu1 %176  ;;  %v174_v48 = vpop.permute.xlu0 %173 }
  0xde   :  { %v1184_v60 = vcombine.low %v1128_v33, %v1144_v22  ;;  %v1185_v45 = vcombine.high %v1128_v33, %v1144_v22  ;;  %v1224_v57 = vcombine.low %v171_v50, %v177_v34  ;;  %v1225_v40 = vcombine.high %v171_v50, %v177_v34 }
  0xdf   :  { %351 = vrot.lane.b32.xlu1 %v4121_v20, %s6406_s4  ;;  %348 = vrot.lane.b32.xlu0 %v4121_v20, %s6407_s5  ;;  %v4474_v22 = vrot.slane %v1153_v53, %v4148_v36 }
  0xe0   :  { %v4468_v4 = vrot.slane %v1184_v60, %v4148_v36  ;;  %v4471_v27 = vrot.slane %v1185_v45, %v4148_v36  ;;  %v1232_v53 = vrot.slane %v1224_v57, %v4104_v14  ;;  %v1239_v60 = vrot.slane %v1225_v40, %v4104_v14 }
  0xe1   :  { %v183_v0 = vpop.permute.xlu1 %182  ;;  %v180_v1 = vpop.permute.xlu0 %179  ;;  %6409 = vst [vmem:[#allocation57_spill] sm:$0xff] %v4474_v22 }
  0xe2   :  { %6408 = vst [vmem:[#allocation56_spill] sm:$0xff] %v4471_v27  ;;  %v1240_v33 = vcombine.low %v174_v48, %v180_v1  ;;  %v1241_v19 = vcombine.high %v174_v48, %v180_v1 }
  0xe3   :  { %357 = vrot.lane.b32.xlu1 %v4121_v20, %s6410_s7  ;;  %354 = vrot.lane.b32.xlu0 %v4121_v20, %s6411_s10 }
  0xe4   :  { %v1248_v48 = vrot.slane %v1240_v33, %v4104_v14  ;;  %v1255_v1 = vrot.slane %v1241_v19, %v4104_v14 }
  0xe5   :  { %v189_v34 = vpop.permute.xlu1 %188  ;;  %v186_v50 = vpop.permute.xlu0 %185 }
  0xe6   :  { %v1289_v49 = vcombine.high %v1232_v53, %v1248_v48  ;;  %v1305_v54 = vcombine.high %v1239_v60, %v1255_v1  ;;  %v1256_v45 = vcombine.low %v183_v0, %v189_v34  ;;  %v1257_v5 = vcombine.high %v183_v0, %v189_v34 }
  0xe7   :  { %363 = vrot.lane.b32.xlu1 %v4121_v20, %s6412_s11  ;;  %360 = vrot.lane.b32.xlu0 %v4121_v20, %s6413_s13  ;;  %v1288_v33 = vcombine.low %v1232_v53, %v1248_v48  ;;  %v1304_v34 = vcombine.low %v1239_v60, %v1255_v1 }
  0xe8   :  { %v1264_v19 = vrot.slane %v1256_v45, %v4104_v14  ;;  %v1271_v55 = vrot.slane %v1257_v5, %v4104_v14  ;;  %v4528_v1 = vrot.slane %v1289_v49, %v4148_v36 }
  0xe9   :  { %v4494_v30 = vpop.permute.xlu1 %194  ;;  %v192_v57 = vpop.permute.xlu0 %191 }
  0xea   :  { %6414 = vst [vmem:[#allocation58_spill] sm:$0xff] %v4494_v30  ;;  %v1272_v40 = vcombine.low %v186_v50, %v192_v57  ;;  %v1273_v37 = vcombine.high %v186_v50, %v192_v57  ;;  %6423 = vst [vmem:[#allocation64_spill] sm:$0xff] %v4528_v1 }
  0xeb   :  { %369 = vrot.lane.b32.xlu1 %v4121_v20, %s6415_s14  ;;  %366 = vrot.lane.b32.xlu0 %v4121_v20, %s6416_s1 }
  0xec   :  { %v1280_v59 = vrot.slane %v1272_v40, %v4104_v14  ;;  %v1287_v0 = vrot.slane %v1273_v37, %v4104_v14  ;;  %v4515_v37 = vrot.slane %v1288_v33, %v4148_v36 }
  0xed   :  { %v4504_v38 = vpop.permute.xlu1 %200  ;;  %v4506_v46 = vpop.permute.xlu0 %197 }
  0xee   :  { %6417 = vst [vmem:[#allocation59_spill] sm:$0xff] %v4504_v38  ;;  %6418 = vst [vmem:[#allocation60_spill] sm:$0xff] %v4506_v46  ;;  %v1320_v53 = vcombine.low %v1264_v19, %v1280_v59  ;;  %v1321_v48 = vcombine.high %v1264_v19, %v1280_v59  ;;  %v1336_v50 = vcombine.low %v1271_v55, %v1287_v0 }
  0xef   :  { %v1337_v57 = vcombine.high %v1271_v55, %v1287_v0  ;;  %375 = vrot.lane.b32.xlu1 %v4121_v20, %s3934_s6  ;;  %372 = vrot.lane.b32.xlu0 %v4121_v20, %s6419_s15  ;;  %v1360_v45 = vcombine.low %v4494_v30, %v4504_v38  ;;  %v4538_v0 = vrot.slane %v1304_v34, %v4148_v36  ;;  %s6426_s6 = smov 20  }
  0xf0   :  { %v4518_v5 = vrot.slane %v1320_v53, %v4148_v36  ;;  %v4521_v60 = vrot.slane %v1321_v48, %v4148_v36  ;;  %v4531_v40 = vrot.slane %v1336_v50, %v4148_v36 }
  0xf1   :  { %v4523_v59 = vpop.permute.xlu1 %206  ;;  %v4525_v55 = vpop.permute.xlu0 %203  ;;  %6425 = vst [vmem:[#allocation66_spill] sm:$0xff] %v4538_v0  ;;  %v4549_v48 = vrot.slane %v1337_v57, %v4148_v36  ;;  %v1368_v50 = vrot.slane %v1360_v45, %v4104_v14 }
  0xf2   :  { %6420 = vst [vmem:[#allocation61_spill] sm:$0xff] %v4521_v60  ;;  %6421 = vst [vmem:[#allocation62_spill] sm:$0xff] %v4523_v59  ;;  %v1376_v33 = vcombine.low %v4506_v46, %v4525_v55  ;;  %v4560_v46 = vrot.slane %v1305_v54, %v4148_v36 }
  0xf3   :  { %6422 = vst [vmem:[#allocation63_spill] sm:$0xff] %v4525_v55  ;;  %6424 = vst [vmem:[#allocation65_spill] sm:$0xff] %v4531_v40  ;;  %381 = vrot.lane.b32.xlu1 %v4121_v20, %s3936_s9  ;;  %378 = vrot.lane.b32.xlu0 %v4121_v20, %s6426_s6  ;;  %s6431_s9 = smov 14  }
  0xf4   :  { %6427 = vst [vmem:[#allocation67_spill] sm:$0xff] %v4549_v48  ;;  %v1384_v34 = vrot.slane %v1376_v33, %v4104_v14  ;;  %6430 = vst [vmem:[#allocation70_spill] sm:$0xff] %v4560_v46 }
  0xf5   :  { %v4553_v19 = vpop.permute.xlu1 %212  ;;  %v4555_v30 = vpop.permute.xlu0 %209 }
  0xf6   :  { %6428 = vst [vmem:[#allocation68_spill] sm:$0xff] %v4553_v19  ;;  %6429 = vst [vmem:[#allocation69_spill] sm:$0xff] %v4555_v30  ;;  %v1425_v49 = vcombine.high %v1368_v50, %v1384_v34  ;;  %v1392_v45 = vcombine.low %v4523_v59, %v4553_v19  ;;  %v1424_v55 = vcombine.low %v1368_v50, %v1384_v34 }
  0xf7   :  { %387 = vrot.lane.b32.xlu1 %v4121_v20, %s6431_s9  ;;  %384 = vrot.lane.b32.xlu0 %v4121_v20, %s6432_s16 }
  0xf8   :  { %v1400_v57 = vrot.slane %v1392_v45, %v4104_v14  ;;  %v4589_v50 = vrot.slane %v1424_v55, %v4148_v36 }
  0xf9   :  { %v220_v33 = vpop.permute.xlu1 %219  ;;  %v4570_v53 = vpop.permute.xlu0 %215 }
  0xfa   :  { %6433 = vst [vmem:[#allocation71_spill] sm:$0xff] %v4570_v53  ;;  %v1408_v38 = vcombine.low %v4555_v30, %v4570_v53 }
  0xfb   :  { %393 = vrot.lane.b32.xlu1 %v4121_v20, %s6434_s17  ;;  %390 = vrot.lane.b32.xlu0 %v4121_v20, %s6435_s18 }
  0xfc   :  { %v1416_v59 = vrot.slane %v1408_v38, %v4104_v14 }
  0xfd   :  { %v226_v19 = vpop.permute.xlu1 %225  ;;  %v223_v0 = vpop.permute.xlu0 %222 }
  0xfe   :  { %v1456_v40 = vcombine.low %v1400_v57, %v1416_v59  ;;  %v1457_v58 = vcombine.high %v1400_v57, %v1416_v59  ;;  %v1512_v2 = vcombine.low %v220_v33, %v226_v19  ;;  %v1513_v54 = vcombine.high %v220_v33, %v226_v19 }
  0xff   :  { %v1496_v48 = vcombine.low %v4121_v20, %v223_v0  ;;  %v1497_v46 = vcombine.high %v4121_v20, %v223_v0  ;;  %399 = vrot.lane.b32.xlu1 %v4121_v20, %s3943_s12  ;;  %396 = vrot.lane.b32.xlu0 %v4121_v20, %s6436_s19  ;;  %v4595_v59 = vrot.slane %v1425_v49, %v4148_v36 }
 0x100   :  { %v4592_v38 = vrot.slane %v1456_v40, %v4148_v36  ;;  %v4598_v19 = vrot.slane %v1457_v58, %v4148_v36  ;;  %v1520_v0 = vrot.slane %v1512_v2, %v4104_v14  ;;  %v1527_v34 = vrot.slane %v1513_v54, %v4104_v14 }
 0x101   :  { %6437 = vst [vmem:[#allocation72_spill] sm:$0xff] %v4595_v59  ;;  %v1504_v57 = vrot.slane %v1496_v48, %v4104_v14  ;;  %v1511_v45 = vrot.slane %v1497_v46, %v4104_v14  ;;  %v232_v33 = vpop.permute.xlu1 %231  ;;  %v229_v55 = vpop.permute.xlu0 %228 }
 0x102   :  { %6438 = vst [vmem:[#allocation73_spill] sm:$0xff] %v4598_v19 }
 0x103   :  { %v1561_v30 = vcombine.high %v1504_v57, %v1520_v0  ;;  %v1577_v53 = vcombine.high %v1511_v45, %v1527_v34  ;;  %405 = vrot.lane.b32.xlu1 %v4121_v20, %s3945_s0  ;;  %402 = vrot.lane.b32.xlu0 %v4121_v20, %s3942_s8  ;;  %v1560_v15 = vcombine.low %v1504_v57, %v1520_v0  ;;  %s3946_s8 = smov [#allocation2]  }
 0x104   :  { %s3783_s12 = sshll.u32 %s3946_s8, 4  ;;  %s3784_s12 = int_to_ptr.vmem [resolvable:$true] %s3783_s12 }
 0x105   :  { %v238_v46 = vpop.permute.xlu1 %237  ;;  %v235_v2 = vpop.permute.xlu0 %234  ;;  %v4633_v0 = vrot.slane %v1560_v15, %v4148_v36  ;;  %v4636_v57 = vrot.slane %v1561_v30, %v4148_v36  ;;  %s3857_s0 = scalar_lea.vmem %s3784_s12, 128  ;;  %p3862_p1 = scmp.lt.s32.totalorder %s3784_s12, %s3784_s12 }
 0x106   :  { %v1544_v48 = vcombine.low %v232_v33, %v238_v46  ;;  %v1545_v54 = vcombine.high %v232_v33, %v238_v46  ;;  %v1528_v13 = vcombine.low %v229_v55, %v235_v2  ;;  %v1529_v40 = vcombine.high %v229_v55, %v235_v2  ;;  %p3858_p0 = scmp.ne.s32.totalorder %s3784_s12, %s3857_s0  ;;  %p3863_p2 = scmp.lt.s32.totalorder %s3857_s0, %s3857_s0 }
 0x107   :  { %v1576_v46 = vcombine.low %v1511_v45, %v1527_v34  ;;  %6444 = vst [vmem:[#allocation79_spill] sm:$0xff] %v4636_v57 }
 0x108   :  { %v1552_v28 = vrot.slane %v1544_v48, %v4104_v14  ;;  %v1559_v49 = vrot.slane %v1545_v54, %v4104_v14  ;;  %v1536_v58 = vrot.slane %v1528_v13, %v4104_v14  ;;  %v1543_v3 = vrot.slane %v1529_v40, %v4104_v14  ;;  %p3864_p3 = por %p3863_p2, %p3862_p1 }
 0x109   :  { %v4618_v29 = vpop.permute.xlu1 %243  ;;  %v4620_v35 = vpop.permute.xlu0 %240  ;;  %v4661_v48 = vrot.slane %v1576_v46, %v4148_v36  ;;  %v4664_v54 = vrot.slane %v1577_v53, %v4148_v36 }
 0x10a   :  { %6439 = vst [vmem:[#allocation74_spill] sm:$0xff] %v4618_v29  ;;  %6440 = vst [vmem:[#allocation75_spill] sm:$0xff] %v4620_v35  ;;  %v1592_v20 = vcombine.low %v1536_v58, %v1552_v28  ;;  %v1593_v12 = vcombine.high %v1536_v58, %v1552_v28  ;;  %v1608_v11 = vcombine.low %v1543_v3, %v1559_v49  ;;  %p3865_p4 = pnand %p3864_p3, %p3858_p0 }
 0x10b   :  { %v1609_v17 = vcombine.high %v1543_v3, %v1559_v49  ;;  %6449 = vst [vmem:[#allocation84_spill] sm:$0xff] %v4661_v48  ;;  %6450 = vst [vmem:[#allocation85_spill] sm:$0xff] %v4664_v54 }
 0x10c   :  { %v4623_v33 = vrot.slane %v1592_v20, %v4148_v36  ;;  %v4626_v55 = vrot.slane %v1593_v12, %v4148_v36  ;;  %v4643_v12 = vrot.slane %v1608_v11, %v4148_v36 }
 0x10d   :  { %v4628_v2 = vpop.permute.xlu1 %249  ;;  %v4630_v13 = vpop.permute.xlu0 %246  ;;  %v4652_v30 = vrot.slane %v1609_v17, %v4148_v36 }
 0x10e   :  { %6441 = vst [vmem:[#allocation76_spill] sm:$0xff] %v4626_v55  ;;  %6442 = vst [vmem:[#allocation77_spill] sm:$0xff] %v4628_v2  ;;  %v1648_v3 = vcombine.low %v4618_v29, %v4628_v2  ;;  %v1632_v28 = vcombine.low %v4620_v35, %v4630_v13 }
 0x10f   :  { %6443 = vst [vmem:[#allocation78_spill] sm:$0xff] %v4630_v13  ;;  %6445 = vst [vmem:[#allocation80_spill] sm:$0xff] %v4643_v12  ;;  %v536_v12 = vcombine.low %v4161_v42, %v4164_v43 }
 0x110   :  { %6446 = vst [vmem:[#allocation81_spill] sm:$0xff] %v4652_v30  ;;  %v1656_v40 = vrot.slane %v1648_v3, %v4104_v14  ;;  %v1640_v49 = vrot.slane %v1632_v28, %v4104_v14 }
 0x111   :  { %v4656_v58 = vpop.permute.xlu1 %255  ;;  %v4658_v11 = vpop.permute.xlu0 %252 }
 0x112   :  { %6447 = vst [vmem:[#allocation82_spill] sm:$0xff] %v4656_v58  ;;  %6448 = vst [vmem:[#allocation83_spill] sm:$0xff] %v4658_v11  ;;  %v1697_v20 = vcombine.high %v1640_v49, %v1656_v40  ;;  %v1696_v35 = vcombine.low %v1640_v49, %v1656_v40 }
 0x114   :  { %v4694_v40 = vrot.slane %v1697_v20, %v4148_v36 }
 0x115   :  { %v4672_v28 = vpop.permute.xlu1 %261  ;;  %v4674_v45 = vpop.permute.xlu0 %258 }
 0x116   :  { %6451 = vst [vmem:[#allocation86_spill] sm:$0xff] %v4672_v28  ;;  %6452 = vst [vmem:[#allocation87_spill] sm:$0xff] %v4674_v45  ;;  %v1680_v46 = vcombine.low %v4656_v58, %v4672_v28  ;;  %v1664_v53 = vcombine.low %v4658_v11, %v4674_v45  ;;  %v944_v28 = vcombine.low %v4339_v32, %v4342_v24 }
 0x117   :  { %6454 = vst [vmem:[#allocation89_spill] sm:$0xff] %v4694_v40 }
 0x118   :  { %v1688_v34 = vrot.slane %v1680_v46, %v4104_v14  ;;  %v1672_v15 = vrot.slane %v1664_v53, %v4104_v14  ;;  %v4691_v46 = vrot.slane %v1696_v35, %v4148_v36 }
 0x119   :  { %v268_v13 = vpop.permute.xlu1 %267  ;;  %v265_v17 = vpop.permute.xlu0 %264 }
 0x11a   :  { %v1728_v29 = vcombine.low %v1672_v15, %v1688_v34  ;;  %v1729_v2 = vcombine.high %v1672_v15, %v1688_v34 }
 0x11c   :  { %v4683_v3 = vrot.slane %v1728_v29, %v4148_v36  ;;  %v4686_v30 = vrot.slane %v1729_v2, %v4148_v36  ;;  %v672_v2 = vcombine.low %v4223_v8, %v4226_v9 }
 0x11d   :  { %v274_v54 = vpop.permute.xlu1 %273  ;;  %v271_v48 = vpop.permute.xlu0 %270 }
 0x11e   :  { %6453 = vst [vmem:[#allocation88_spill] sm:$0xff] %v4686_v30  ;;  %v1784_v49 = vcombine.low %v268_v13, %v274_v54  ;;  %v1785_v53 = vcombine.high %v268_v13, %v274_v54  ;;  %v1768_v34 = vcombine.low %v265_v17, %v271_v48  ;;  %v1769_v15 = vcombine.high %v265_v17, %v271_v48 }
 0x11f   :  { %v808_v17 = vcombine.low %v4285_v61, %v4288_v62  ;;  %v2588_v58 = vsel %vm2584_vm0, %v672_v2, 0.0 }
 0x120   :  { %v1792_v35 = vrot.slane %v1784_v49, %v4104_v14  ;;  %v4704_v45 = vrot.slane %v1785_v53, %v4104_v14  ;;  %v1776_v20 = vrot.slane %v1768_v34, %v4104_v14  ;;  %v4708_v13 = vrot.slane %v1769_v15, %v4104_v14 }
 0x121   :  { %v280_v48 = vpop.permute.xlu1 %279  ;;  %v277_v54 = vpop.permute.xlu0 %276  ;;  %v2585_v53 = vsel %vm2584_vm0, %v536_v12, 0.0  ;;  %v2591_v15 = vsel %vm2584_vm0, %v808_v17, 0.0  ;;  %v1216_v12 = vcombine.low %v4465_v51, %v4468_v4  ;;  %v1352_v17 = vcombine.low %v4515_v37, %v4518_v5 }
 0x122   :  { %v1833_v29 = vcombine.high %v1776_v20, %v1792_v35  ;;  %2586 = vadd.xlane.f32.xlu0 %v2585_v53  ;;  %v1848_v40 = vcombine.low %v4708_v13, %v4704_v45 }
 0x125   :  { %v286_v11 = vpop.permute.xlu1 %285  ;;  %v283_v34 = vpop.permute.xlu0 %282 }
 0x126   :  { %v1816_v6 = vcombine.low %v280_v48, %v286_v11  ;;  %v1817_v18 = vcombine.high %v280_v48, %v286_v11  ;;  %v1800_v26 = vcombine.low %v277_v54, %v283_v34  ;;  %v1801_v31 = vcombine.high %v277_v54, %v283_v34  ;;  %2592 = vadd.xlane.f32.xlu0 %v2591_v15 }
 0x127   :  { %2589 = vadd.xlane.f32.xlu1 %v2588_v58  ;;  %v1832_v11 = vcombine.low %v1776_v20, %v1792_v35  ;;  %v2594_v58 = vsel %vm2584_vm0, %v944_v28, 0.0 }
 0x128   :  { %v1824_v2 = vrot.slane %v1816_v6, %v4104_v14  ;;  %v4729_v53 = vrot.slane %v1817_v18, %v4104_v14  ;;  %v1808_v49 = vrot.slane %v1800_v26, %v4104_v14  ;;  %v4733_v30 = vrot.slane %v1801_v31, %v4104_v14 }
 0x129   :  { %v292_v48 = vpop.permute.xlu1 %291  ;;  %v289_v54 = vpop.permute.xlu0 %288  ;;  %v2597_v6 = vsel %vm2584_vm0, %v1080_v25, 0.0  ;;  %v2600_v18 = vsel %vm2584_vm0, %v1216_v12, 0.0  ;;  %v2603_v26 = vsel %vm2584_vm0, %v1352_v17, 0.0  ;;  %v1624_v25 = vcombine.low %v4633_v0, %v4623_v33 }
 0x12a   :  { %v1864_v34 = vcombine.low %v1808_v49, %v1824_v2  ;;  %v1865_v15 = vcombine.high %v1808_v49, %v1824_v2  ;;  %2595 = vadd.xlane.f32.xlu0 %v2594_v58  ;;  %v1488_v49 = vcombine.low %v4589_v50, %v4592_v38  ;;  %v4752_v2 = vrot.slane %v1832_v11, %v4148_v36 }
 0x12b   :  { %2598 = vadd.xlane.f32.xlu1 %v2597_v6  ;;  %v4755_v12 = vrot.slane %v1833_v29, %v4148_v36  ;;  %v6467_v10 = vcombine.high %v4733_v30, %v4729_v53 }
 0x12c   :  { %v4742_v31 = vrot.slane %v1864_v34, %v4148_v36  ;;  %v4745_v35 = vrot.slane %v1865_v15, %v4148_v36 }
 0x12d   :  { %v298_v28 = vpop.permute.xlu1 %297  ;;  %v295_v20 = vpop.permute.xlu0 %294  ;;  %6456 = vst [vmem:[#allocation91_spill] sm:$0xff] %v4755_v12 }
 0x12e   :  { %6455 = vst [vmem:[#allocation90_spill] sm:$0xff] %v4745_v35  ;;  %v1920_v17 = vcombine.low %v292_v48, %v298_v28  ;;  %v1921_v58 = vcombine.high %v292_v48, %v298_v28  ;;  %v1904_v34 = vcombine.low %v289_v54, %v295_v20  ;;  %v1905_v6 = vcombine.high %v289_v54, %v295_v20 }
 0x12f   :  { %2601 = vadd.xlane.f32.xlu0 %v2600_v18  ;;  %2604 = vadd.xlane.f32.xlu1 %v2603_v26  ;;  %v1760_v18 = vcombine.low %v4691_v46, %v4683_v3  ;;  %v1896_v26 = vcombine.low %v4752_v2, %v4742_v31 }
 0x130   :  { %v1928_v19 = vrot.slane %v1920_v17, %v4104_v14  ;;  %v4763_v11 = vrot.slane %v1921_v58, %v4104_v14  ;;  %v1912_v29 = vrot.slane %v1904_v34, %v4104_v14  ;;  %v4767_v59 = vrot.slane %v1905_v6, %v4104_v14 }
 0x131   :  { %v304_v48 = vpop.permute.xlu1 %303  ;;  %v301_v54 = vpop.permute.xlu0 %300  ;;  %v2606_v17 = vsel %vm2584_vm0, %v1488_v49, 0.0  ;;  %v2609_v58 = vsel %vm2584_vm0, %v1624_v25, 0.0  ;;  %v1880_v34 = vcombine.low %v4733_v30, %v4729_v53  ;;  %v2612_v22 = vsel %vm2584_vm0, %v1760_v18, 0.0 }
 0x132   :  { %6457 = vst [vmem:[#allocation92_spill] sm:$0xff] %v4763_v11  ;;  %6458 = vst [vmem:[#allocation93_spill] sm:$0xff] %v4767_v59  ;;  %v1969_v28 = vcombine.high %v1912_v29, %v1928_v19  ;;  %v1985_v20 = vcombine.high %v4767_v59, %v4763_v11  ;;  %v2615_v59 = vsel %vm2584_vm0, %v1896_v26, 0.0  ;;  %v1968_v26 = vcombine.low %v1912_v29, %v1928_v19 }
 0x133   :  { %2607 = vadd.xlane.f32.xlu0 %v2606_v17  ;;  %2610 = vadd.xlane.f32.xlu1 %v2609_v58  ;;  %v4786_v17 = vrot.slane %v1880_v34, %v4148_v36 }
 0x134   :  { %v4810_v34 = vrot.slane %v1968_v26, %v4148_v36 }
 0x135   :  { %v310_v15 = vpop.permute.xlu1 %309  ;;  %v307_v27 = vpop.permute.xlu0 %306  ;;  %6459 = vst [vmem:[#allocation94_spill] sm:$0xff] %v4786_v17 }
 0x136   :  { %v1952_v49 = vcombine.low %v304_v48, %v310_v15  ;;  %v1953_v11 = vcombine.high %v304_v48, %v310_v15  ;;  %v1936_v25 = vcombine.low %v301_v54, %v307_v27  ;;  %v1937_v56 = vcombine.high %v301_v54, %v307_v27 }
 0x137   :  { %2613 = vadd.xlane.f32.xlu0 %v2612_v22  ;;  %2616 = vadd.xlane.f32.xlu1 %v2615_v59  ;;  %v4797_v27 = vrot.slane %v1848_v40, %v4148_v36  ;;  %v4813_v40 = vrot.slane %v1969_v28, %v4148_v36 }
 0x138   :  { %v1960_v58 = vrot.slane %v1952_v49, %v4104_v14  ;;  %v4790_v6 = vrot.slane %v1953_v11, %v4104_v14  ;;  %v1944_v23 = vrot.slane %v1936_v25, %v4104_v14  ;;  %v4794_v18 = vrot.slane %v1937_v56, %v4104_v14 }
 0x139   :  { %v316_v35 = vpop.permute.xlu1 %315  ;;  %v313_v15 = vpop.permute.xlu0 %312  ;;  %6462 = vst [vmem:[#allocation97_spill] sm:$0xff] %v4797_v27  ;;  %6464 = vst [vmem:[#allocation99_spill] sm:$0xff] %v4813_v40 }
 0x13a   :  { %6460 = vst [vmem:[#allocation95_spill] sm:$0xff] %v4790_v6  ;;  %6461 = vst [vmem:[#allocation96_spill] sm:$0xff] %v4794_v18  ;;  %v2000_v22 = vcombine.low %v1944_v23, %v1960_v58  ;;  %v2001_v59 = vcombine.high %v1944_v23, %v1960_v58  ;;  %v2017_v48 = vcombine.high %v4794_v18, %v4790_v6 }
 0x13c   :  { %v4804_v54 = vrot.slane %v2000_v22, %v4148_v36  ;;  %v4807_v56 = vrot.slane %v2001_v59, %v4148_v36 }
 0x13d   :  { %v322_v19 = vpop.permute.xlu1 %321  ;;  %v319_v29 = vpop.permute.xlu0 %318 }
 0x13e   :  { %6463 = vst [vmem:[#allocation98_spill] sm:$0xff] %v4807_v56  ;;  %v2056_v23 = vcombine.low %v316_v35, %v322_v19  ;;  %v2057_v49 = vcombine.high %v316_v35, %v322_v19  ;;  %v2040_v25 = vcombine.low %v313_v15, %v319_v29  ;;  %v2041_v58 = vcombine.high %v313_v15, %v319_v29 }
 0x13f   :  { %v2032_v11 = vcombine.low %v4810_v34, %v4804_v54 }
 0x140   :  { %v2064_v18 = vrot.slane %v2056_v23, %v4104_v14  ;;  %v4823_v26 = vrot.slane %v2057_v49, %v4104_v14  ;;  %v2048_v28 = vrot.slane %v2040_v25, %v4104_v14  ;;  %v4827_v35 = vrot.slane %v2041_v58, %v4104_v14 }
 0x141   :  { %v328_v15 = vpop.permute.xlu1 %327  ;;  %v2618_v19 = vsel %vm2584_vm0, %v2032_v11, 0.0  ;;  %v325_v29 = vpop.permute.xlu0 %324  ;;  %v4835_v49 = vrot.slane %v2017_v48, %v4148_v36  ;;  %v4838_v11 = vrot.slane %v1985_v20, %v4148_v36 }
 0x142   :  { %v2105_v6 = vcombine.high %v2048_v28, %v2064_v18  ;;  %v2121_v22 = vcombine.high %v4827_v35, %v4823_v26  ;;  %2619 = vadd.xlane.f32.xlu0 %v2618_v19  ;;  %v4844_v19 = vrot.slane %v6467_v10, %v4148_v36  ;;  %v6469_v10 = vcombine.high %v4708_v13, %v4704_v45 }
 0x143   :  { %6465 = vst [vmem:[#allocation100_spill] sm:$0xff] %v4835_v49  ;;  %6466 = vst [vmem:[#allocation101_spill] sm:$0xff] %v4838_v11  ;;  %v2120_v45 = vcombine.low %v4827_v35, %v4823_v26 }
 0x144   :  { %6468 = vst [vmem:[#allocation102_spill] sm:$0xff] %v4844_v19  ;;  %v4858_v30 = vrot.slane %v6469_v10, %v4148_v36 }
 0x145   :  { %v334_v59 = vpop.permute.xlu1 %333  ;;  %v331_v27 = vpop.permute.xlu0 %330 }
 0x146   :  { %v2088_v25 = vcombine.low %v328_v15, %v334_v59  ;;  %v2089_v58 = vcombine.high %v328_v15, %v334_v59  ;;  %v2072_v17 = vcombine.low %v325_v29, %v331_v27  ;;  %v2073_v12 = vcombine.high %v325_v29, %v331_v27  ;;  %6470 = vst [vmem:[#allocation103_spill] sm:$0xff] %v4858_v30 }
 0x147   :  { %v2104_v59 = vcombine.low %v2048_v28, %v2064_v18  ;;  %v4893_v29 = vrot.slane %v2120_v45, %v4148_v36 }
 0x148   :  { %v2096_v16 = vrot.slane %v2088_v25, %v4104_v14  ;;  %v2103_v23 = vrot.slane %v2089_v58, %v4104_v14  ;;  %v2080_v48 = vrot.slane %v2072_v17, %v4104_v14  ;;  %v2087_v56 = vrot.slane %v2073_v12, %v4104_v14 }
 0x149   :  { %v340_v15 = vpop.permute.xlu1 %339  ;;  %v337_v27 = vpop.permute.xlu0 %336  ;;  %6474 = vst [vmem:[#allocation107_spill] sm:$0xff] %v4893_v29 }
 0x14a   :  { %v2136_v53 = vcombine.low %v2080_v48, %v2096_v16  ;;  %v2137_v25 = vcombine.high %v2080_v48, %v2096_v16  ;;  %v2153_v17 = vcombine.high %v2087_v56, %v2103_v23  ;;  %v2152_v58 = vcombine.low %v2087_v56, %v2103_v23 }
 0x14b   :  { %v4873_v16 = vrot.slane %v2104_v59, %v4148_v36  ;;  %v4876_v56 = vrot.slane %v2105_v6, %v4148_v36 }
 0x14c   :  { %v4863_v18 = vrot.slane %v2136_v53, %v4148_v36  ;;  %v4866_v28 = vrot.slane %v2137_v25, %v4148_v36  ;;  %v4885_v35 = vrot.slane %v2152_v58, %v4148_v36 }
 0x14d   :  { %v346_v13 = vpop.permute.xlu1 %345  ;;  %v343_v10 = vpop.permute.xlu0 %342  ;;  %6472 = vst [vmem:[#allocation105_spill] sm:$0xff] %v4876_v56 }
 0x14e   :  { %6471 = vst [vmem:[#allocation104_spill] sm:$0xff] %v4866_v28  ;;  %v2192_v23 = vcombine.low %v340_v15, %v346_v13  ;;  %v2193_v48 = vcombine.high %v340_v15, %v346_v13  ;;  %v2176_v53 = vcombine.low %v337_v27, %v343_v10  ;;  %v2177_v12 = vcombine.high %v337_v27, %v343_v10 }
 0x14f   :  { %v2168_v25 = vcombine.low %v4873_v16, %v4863_v18  ;;  %6473 = vst [vmem:[#allocation106_spill] sm:$0xff] %v4885_v35 }
 0x150   :  { %v2200_v59 = vrot.slane %v2192_v23, %v4104_v14  ;;  %v2207_v6 = vrot.slane %v2193_v48, %v4104_v14  ;;  %v2184_v15 = vrot.slane %v2176_v53, %v4104_v14  ;;  %v2191_v27 = vrot.slane %v2177_v12, %v4104_v14 }
 0x151   :  { %v352_v13 = vpop.permute.xlu1 %351  ;;  %v2621_v10 = vsel %vm2584_vm0, %v2168_v25, 0.0  ;;  %v349_v20 = vpop.permute.xlu0 %348  ;;  %v4898_v23 = vrot.slane %v2153_v17, %v4148_v36  ;;  %v4901_v12 = vrot.slane %v2121_v22, %v4148_v36 }
 0x152   :  { %v2241_v19 = vcombine.high %v2184_v15, %v2200_v59  ;;  %v2257_v26 = vcombine.high %v2191_v27, %v2207_v6  ;;  %2622 = vadd.xlane.f32.xlu1 %v2621_v10  ;;  %v2240_v22 = vcombine.low %v2184_v15, %v2200_v59 }
 0x153   :  { %6475 = vst [vmem:[#allocation108_spill] sm:$0xff] %v4898_v23  ;;  %6476 = vst [vmem:[#allocation109_spill] sm:$0xff] %v4901_v12 }
 0x155   :  { %v358_v48 = vpop.permute.xlu1 %357  ;;  %v355_v53 = vpop.permute.xlu0 %354 }
 0x156   :  { %v2224_v30 = vcombine.low %v352_v13, %v358_v48  ;;  %v2225_v25 = vcombine.high %v352_v13, %v358_v48  ;;  %v2208_v49 = vcombine.low %v349_v20, %v355_v53  ;;  %v2209_v11 = vcombine.high %v349_v20, %v355_v53 }
 0x158   :  { %v2232_v58 = vrot.slane %v2224_v30, %v4104_v14  ;;  %v2239_v17 = vrot.slane %v2225_v25, %v4104_v14  ;;  %v2216_v29 = vrot.slane %v2208_v49, %v4104_v14  ;;  %v2223_v35 = vrot.slane %v2209_v11, %v4104_v14 }
 0x159   :  { %v364_v40 = vpop.permute.xlu1 %363  ;;  %v361_v28 = vpop.permute.xlu0 %360  ;;  %v2256_v30 = vcombine.low %v2191_v27, %v2207_v6  ;;  %v4918_v49 = vrot.slane %v2240_v22, %v4148_v36  ;;  %v4921_v11 = vrot.slane %v2241_v19, %v4148_v36 }
 0x15a   :  { %v2272_v13 = vcombine.low %v2216_v29, %v2232_v58  ;;  %v2273_v48 = vcombine.high %v2216_v29, %v2232_v58  ;;  %v2288_v20 = vcombine.low %v2223_v35, %v2239_v17  ;;  %v2289_v53 = vcombine.high %v2223_v35, %v2239_v17 }
 0x15b   :  { %6478 = vst [vmem:[#allocation111_spill] sm:$0xff] %v4921_v11 }
 0x15c   :  { %v4912_v45 = vrot.slane %v2272_v13, %v4148_v36  ;;  %v4915_v10 = vrot.slane %v2273_v48, %v4148_v36  ;;  %v4924_v59 = vrot.slane %v2288_v20, %v4148_v36  ;;  %v4933_v22 = vrot.slane %v2289_v53, %v4148_v36 }
 0x15d   :  { %v370_v23 = vpop.permute.xlu1 %369  ;;  %v367_v25 = vpop.permute.xlu0 %366  ;;  %v4944_v53 = vrot.slane %v2257_v26, %v4148_v36 }
 0x15e   :  { %6477 = vst [vmem:[#allocation110_spill] sm:$0xff] %v4915_v10  ;;  %6479 = vst [vmem:[#allocation112_spill] sm:$0xff] %v4924_v59  ;;  %v2328_v29 = vcombine.low %v364_v40, %v370_v23  ;;  %v2329_v35 = vcombine.high %v364_v40, %v370_v23  ;;  %v2312_v15 = vcombine.low %v361_v28, %v367_v25 }
 0x15f   :  { %v2313_v58 = vcombine.high %v361_v28, %v367_v25  ;;  %v2304_v17 = vcombine.low %v4918_v49, %v4912_v45  ;;  %6480 = vst [vmem:[#allocation113_spill] sm:$0xff] %v4933_v22  ;;  %v4941_v25 = vrot.slane %v2256_v30, %v4148_v36  ;;  %6482 = vst [vmem:[#allocation115_spill] sm:$0xff] %v4944_v53 }
 0x160   :  { %v2336_v19 = vrot.slane %v2328_v29, %v4104_v14  ;;  %v2343_v13 = vrot.slane %v2329_v35, %v4104_v14  ;;  %v2320_v40 = vrot.slane %v2312_v15, %v4104_v14 }
 0x161   :  { %v2327_v28 = vrot.slane %v2313_v58, %v4104_v14  ;;  %v376_v23 = vpop.permute.xlu1 %375  ;;  %v2624_v48 = vsel %vm2584_vm0, %v2304_v17, 0.0  ;;  %v373_v20 = vpop.permute.xlu0 %372  ;;  %6481 = vst [vmem:[#allocation114_spill] sm:$0xff] %v4941_v25 }
 0x162   :  { %v2377_v6 = vcombine.high %v2320_v40, %v2336_v19  ;;  %2625 = vadd.xlane.f32.xlu0 %v2624_v48  ;;  %v2376_v25 = vcombine.low %v2320_v40, %v2336_v19 }
 0x163   :  { %v2393_v27 = vcombine.high %v2327_v28, %v2343_v13 }
 0x165   :  { %v382_v15 = vpop.permute.xlu1 %381  ;;  %v379_v58 = vpop.permute.xlu0 %378 }
 0x166   :  { %v2360_v12 = vcombine.low %v376_v23, %v382_v15  ;;  %v2361_v30 = vcombine.high %v376_v23, %v382_v15  ;;  %v2344_v10 = vcombine.low %v373_v20, %v379_v58  ;;  %v2345_v11 = vcombine.high %v373_v20, %v379_v58 }
 0x168   :  { %v2368_v48 = vrot.slane %v2360_v12, %v4104_v14  ;;  %v2375_v26 = vrot.slane %v2361_v30, %v4104_v14  ;;  %v2352_v56 = vrot.slane %v2344_v10, %v4104_v14  ;;  %v2359_v29 = vrot.slane %v2345_v11, %v4104_v14 }
 0x169   :  { %v388_v59 = vpop.permute.xlu1 %387  ;;  %v385_v35 = vpop.permute.xlu0 %384  ;;  %v2392_v12 = vcombine.low %v2327_v28, %v2343_v13  ;;  %v4963_v10 = vrot.slane %v2376_v25, %v4148_v36  ;;  %v4966_v11 = vrot.slane %v2377_v6, %v4148_v36 }
 0x16a   :  { %v2408_v55 = vcombine.low %v2352_v56, %v2368_v48  ;;  %v2409_v57 = vcombine.high %v2352_v56, %v2368_v48  ;;  %v2424_v60 = vcombine.low %v2359_v29, %v2375_v26  ;;  %v2425_v1 = vcombine.high %v2359_v29, %v2375_v26 }
 0x16b   :  { %v4986_v48 = vrot.slane %v2393_v27, %v4148_v36 }
 0x16c   :  { %v4957_v17 = vrot.slane %v2408_v55, %v4148_v36  ;;  %v4960_v23 = vrot.slane %v2409_v57, %v4148_v36  ;;  %v4969_v19 = vrot.slane %v2424_v60, %v4148_v36  ;;  %v4978_v25 = vrot.slane %v2425_v1, %v4148_v36 }
 0x16d   :  { %v394_v20 = vpop.permute.xlu1 %393  ;;  %v391_v15 = vpop.permute.xlu0 %390  ;;  %6485 = vst [vmem:[#allocation118_spill] sm:$0xff] %v4986_v48  ;;  %v4989_v1 = vrot.slane %v2392_v12, %v4148_v36 }
 0x16e   :  { %6483 = vst [vmem:[#allocation116_spill] sm:$0xff] %v4969_v19  ;;  %v2464_v56 = vcombine.low %v388_v59, %v394_v20  ;;  %v2465_v40 = vcombine.high %v388_v59, %v394_v20  ;;  %v2448_v29 = vcombine.low %v385_v35, %v391_v15  ;;  %v2449_v55 = vcombine.high %v385_v35, %v391_v15 }
 0x16f   :  { %v2440_v57 = vcombine.low %v4963_v10, %v4957_v17  ;;  %6484 = vst [vmem:[#allocation117_spill] sm:$0xff] %v4978_v25  ;;  %6486 = vst [vmem:[#allocation119_spill] sm:$0xff] %v4989_v1 }
 0x170   :  { %v2472_v6 = vrot.slane %v2464_v56, %v4104_v14  ;;  %v2479_v60 = vrot.slane %v2465_v40, %v4104_v14  ;;  %v2456_v59 = vrot.slane %v2448_v29, %v4104_v14  ;;  %v2463_v35 = vrot.slane %v2449_v55, %v4104_v14 }
 0x171   :  { %v400_v58 = vpop.permute.xlu1 %399  ;;  %v2627_v30 = vsel %vm2584_vm0, %v2440_v57, 0.0  ;;  %v397_v15 = vpop.permute.xlu0 %396  ;;  %v6487_v55 = vcombine.high %v4161_v42, %v4164_v43  ;;  %v6488_v43 = vcombine.high %v4285_v61, %v4288_v62 }
 0x172   :  { %v2513_v26 = vcombine.high %v2456_v59, %v2472_v6  ;;  %v2529_v20 = vcombine.high %v2463_v35, %v2479_v60  ;;  %2628 = vadd.xlane.f32.xlu1 %v2627_v30  ;;  %v2512_v53 = vcombine.low %v2456_v59, %v2472_v6  ;;  %v2528_v57 = vcombine.low %v2463_v35, %v2479_v60 }
 0x173   :  { %v2633_v27 = vsel %vm2584_vm0, %v6487_v55, 0.0  ;;  %v2639_v55 = vsel %vm2584_vm0, %v6488_v43, 0.0  ;;  %v6489_v6 = vcombine.high %v4401_v39, %v4404_v21  ;;  %v6495_v43 = vcombine.high %v4223_v8, %v4226_v9 }
 0x174   :  { %v5028_v39 = vrot.slane %v2528_v57, %v4148_v36  ;;  %v5031_v21 = vrot.slane %v2529_v20, %v4148_v36  ;;  %v6498_v9 = vcombine.high %v4465_v51, %v4468_v4  ;;  %v6501_v51 = vcombine.high %v4691_v46, %v4683_v3 }
 0x175   :  { %v406_v29 = vpop.permute.xlu1 %405  ;;  %v403_v12 = vpop.permute.xlu0 %402  ;;  %v6504_v3 = vcombine.low %v4414_v41, %v4407_v52 }
 0x176   :  { %v2496_v30 = vcombine.low %v400_v58, %v406_v29  ;;  %v2497_v28 = vcombine.high %v400_v58, %v406_v29  ;;  %2634 = vadd.xlane.f32.xlu1 %v2633_v27  ;;  %v2480_v13 = vcombine.low %v397_v15, %v403_v12  ;;  %v2481_v22 = vcombine.high %v397_v15, %v403_v12 }
 0x177   :  { %6492 = vst [vmem:[#allocation122_spill] sm:$0xff] %v5031_v21  ;;  %v6494_v12 = vcombine.high %v4633_v0, %v4623_v33  ;;  %v2169_v33 = vcombine.high %v4873_v16, %v4863_v18  ;;  %v2648_v0 = vsel %vm2584_vm0, %v6498_v9, 0.0  ;;  %v6500_v18 = vcombine.low %v4174_v47, %v4167_v44  ;;  %v6520_v9 = vld [vmem:[#allocation105_spill] sm:$0xff] }
 0x178   :  { %v2504_v56 = vrot.slane %v2496_v30, %v4104_v14  ;;  %v2511_v40 = vrot.slane %v2497_v28, %v4104_v14  ;;  %v2488_v1 = vrot.slane %v2480_v13, %v4104_v14  ;;  %v2495_v42 = vrot.slane %v2481_v22, %v4104_v14 }
 0x179   :  { %v2645_v28 = vsel %vm2584_vm0, %v6489_v6, 0.0  ;;  %v2520_v13 = vrot.slane %v2512_v53, %v4148_v36  ;;  %v5015_v22 = vrot.slane %v2513_v26, %v4148_v36  ;;  %v2669_v8 = vsel %vm2584_vm0, %v2169_v33, 0.0 }
 0x17a   :  { %2640 = vadd.xlane.f32.xlu1 %v2639_v55  ;;  %v2544_v58 = vcombine.low %v2488_v1, %v2504_v56  ;;  %v2545_v29 = vcombine.high %v2488_v1, %v2504_v56  ;;  %v2560_v27 = vcombine.low %v2495_v42, %v2511_v40  ;;  %v2561_v15 = vcombine.high %v2495_v42, %v2511_v40  ;;  %v6610_v56 = vld [vmem:[#allocation87_spill] sm:$0xff] }
 0x17b   :  { %v6493_v40 = vcombine.high %v4515_v37, %v4518_v5  ;;  %v2657_v42 = vsel %vm2584_vm0, %v6494_v12, 0.0  ;;  %v2636_v55 = vsel %vm2584_vm0, %v6495_v43, 0.0  ;;  %v6496_v37 = vcombine.high %v4752_v2, %v4742_v31  ;;  %v6511_v12 = vld [vmem:[#allocation28_spill] sm:$0xff]  ;;  %v6611_v1 = vld [vmem:[#allocation83_spill] sm:$0xff] }
 0x17c   :  { %v2552_v61 = vrot.slane %v2544_v58, %v4148_v36  ;;  %v5019_v62 = vrot.slane %v2545_v29, %v4148_v36  ;;  %v5022_v60 = vrot.slane %v2560_v27, %v4148_v36  ;;  %v5025_v59 = vrot.slane %v2561_v15, %v4148_v36 }
 0x17d   :  { %v2651_v57 = vsel %vm2584_vm0, %v6493_v40, 0.0  ;;  %v2663_v5 = vsel %vm2584_vm0, %v6496_v37, 0.0  ;;  %v6497_v58 = vcombine.high %v4339_v32, %v4342_v24  ;;  %v2441_v31 = vcombine.high %v4963_v10, %v4957_v17 }
 0x17e   :  { %6490 = vst [vmem:[#allocation120_spill] sm:$0xff] %v5022_v60  ;;  %6491 = vst [vmem:[#allocation121_spill] sm:$0xff] %v5025_v59  ;;  %2646 = vadd.xlane.f32.xlu1 %v2645_v28  ;;  %v2576_v53 = vcombine.low %v2520_v13, %v2552_v61  ;;  %v2578_v35 = vcombine.low %v5015_v22, %v5019_v62  ;;  %v2579_v26 = vcombine.high %v5015_v22, %v5019_v62  ;;  %v6505_v28 = vld [vmem:[#allocation64_spill] sm:$0xff] }
 0x17f   :  { %v2642_v29 = vsel %vm2584_vm0, %v6497_v58, 0.0  ;;  %v2675_v24 = vsel %vm2584_vm0, %v2441_v31, 0.0  ;;  %v6499_v32 = vcombine.high %v4589_v50, %v4592_v38  ;;  %v2681_v4 = vsel %vm2584_vm0, %v6500_v18, 0.0  ;;  %v6517_v58 = vld [vmem:[#allocation41_spill] sm:$0xff]  ;;  %v6613_v59 = vld [vmem:[#allocation84_spill] sm:$0xff] }
 0x180   :  { %v2630_v20 = vsel %vm2584_vm0, %v2576_v53, 0.0  ;;  %v2660_v16 = vsel %vm2584_vm0, %v6501_v51, 0.0  ;;  %v6502_v17 = vcombine.low %v4298_v7, %v4291_v63  ;;  %v6503_v38 = vcombine.high %v4810_v34, %v4804_v54  ;;  %v6506_v53 = vld [vmem:[#allocation61_spill] sm:$0xff] }
 0x181   :  { %2631 = vadd.xlane.f32.xlu0 %v2630_v20  ;;  %v2654_v2 = vsel %vm2584_vm0, %v6499_v32, 0.0  ;;  %v2305_v27 = vcombine.high %v4918_v49, %v4912_v45  ;;  %v2693_v46 = vsel %vm2584_vm0, %v6504_v3, 0.0  ;;  %v2577_v6 = vcombine.high %v2520_v13, %v2552_v61  ;;  %v6508_v45 = vld [vmem:[#allocation79_spill] sm:$0xff]  ;;  %v6509_v49 = vld [vmem:[#allocation76_spill] sm:$0xff]  ;;  %v6523_v32 = vld [vmem:[#allocation57_spill] sm:$0xff] }
 0x182   :  { %2652 = vadd.xlane.f32.xlu1 %v2651_v57  ;;  %v2687_v50 = vsel %vm2584_vm0, %v6502_v17, 0.0  ;;  %v2666_v10 = vsel %vm2584_vm0, %v6503_v38, 0.0  ;;  %v6507_v54 = vcombine.low %v6505_v28, %v6506_v53  ;;  %v6510_v57 = vcombine.low %v6508_v45, %v6509_v49  ;;  %v6514_v61 = vld [vmem:[#allocation91_spill] sm:$0xff]  ;;  %v6527_v17 = vld [vmem:[#allocation72_spill] sm:$0xff] }
 0x183   :  { %v2672_v15 = vsel %vm2584_vm0, %v2305_v27, 0.0  ;;  %v2678_v40 = vsel %vm2584_vm0, %v2577_v6, 0.0  ;;  %v6526_v51 = vcombine.low %v4966_v11, %v4960_v23  ;;  %v6530_v27 = vcombine.high %v4174_v47, %v4167_v44 }
 0x184   :  { %v2699_v34 = vsel %vm2584_vm0, %v6507_v54, 0.0  ;;  %v2705_v20 = vsel %vm2584_vm0, %v6510_v57, 0.0  ;;  %v6535_v57 = vld [vmem:[#allocation99_spill] sm:$0xff]  ;;  %v6538_v44 = vcombine.high %v4414_v41, %v4407_v52  ;;  %v2726_v41 = vsel %vm2584_vm0, %v2578_v35, 0.0  ;;  %v6545_v52 = vld [vmem:[#allocation10_spill] sm:$0xff] }
 0x185   :  { %2637 = vadd.xlane.f32.xlu0 %v2636_v55  ;;  %v6515_v55 = vld [vmem:[#allocation90_spill] sm:$0xff]  ;;  %v2729_v3 = vsel %vm2584_vm0, %v6530_v27, 0.0  ;;  %v6549_v27 = vld [vmem:[#allocation7_spill] sm:$0xff]  ;;  %v6553_v35 = vcombine.high %v6508_v45, %v6509_v49 }
 0x186   :  { %2658 = vadd.xlane.f32.xlu1 %v2657_v42  ;;  %v6512_v42 = vld [vmem:[#allocation25_spill] sm:$0xff]  ;;  %v6516_v37 = vcombine.low %v6514_v61, %v6515_v55  ;;  %v2741_v47 = vsel %vm2584_vm0, %v6538_v44, 0.0  ;;  %v6558_v45 = vld [vmem:[#allocation26_spill] sm:$0xff] }
 0x187   :  { %v6513_v43 = vcombine.low %v6511_v12, %v6512_v42 }
 0x189   :  { %2643 = vadd.xlane.f32.xlu0 %v2642_v29  ;;  %v2684_v13 = vsel %vm2584_vm0, %v6513_v43, 0.0  ;;  %v6518_v29 = vld [vmem:[#allocation40_spill] sm:$0xff] }
 0x18a   :  { %2664 = vadd.xlane.f32.xlu1 %v2663_v5  ;;  %v2711_v5 = vsel %vm2584_vm0, %v6516_v37, 0.0  ;;  %v6519_v33 = vcombine.low %v6517_v58, %v6518_v29  ;;  %v6539_v37 = vld [vmem:[#allocation111_spill] sm:$0xff] }
 0x18d   :  { %2649 = vadd.xlane.f32.xlu0 %v2648_v0  ;;  %v6521_v0 = vld [vmem:[#allocation104_spill] sm:$0xff] }
 0x18e   :  { %2670 = vadd.xlane.f32.xlu1 %v2669_v8  ;;  %v2690_v8 = vsel %vm2584_vm0, %v6519_v33, 0.0  ;;  %v6522_v31 = vcombine.low %v6520_v9, %v6521_v0 }
 0x191   :  { %2655 = vadd.xlane.f32.xlu0 %v2654_v2  ;;  %v6524_v2 = vld [vmem:[#allocation56_spill] sm:$0xff] }
 0x192   :  { %2676 = vadd.xlane.f32.xlu1 %v2675_v24  ;;  %v2717_v24 = vsel %vm2584_vm0, %v6522_v31, 0.0  ;;  %v6525_v18 = vcombine.low %v6523_v32, %v6524_v2 }
 0x195   :  { %2661 = vadd.xlane.f32.xlu0 %v2660_v16  ;;  %v2723_v16 = vsel %vm2584_vm0, %v6526_v51, 0.0 }
 0x196   :  { %2682 = vadd.xlane.f32.xlu1 %v2681_v4  ;;  %v2696_v4 = vsel %vm2584_vm0, %v6525_v18, 0.0 }
 0x199   :  { %2667 = vadd.xlane.f32.xlu0 %v2666_v10 }
 0x19a   :  { %2688 = vadd.xlane.f32.xlu1 %v2687_v50  ;;  %v6528_v50 = vld [vmem:[#allocation73_spill] sm:$0xff] }
 0x19b   :  { %v6529_v38 = vcombine.low %v6527_v17, %v6528_v50 }
 0x19d   :  { %2673 = vadd.xlane.f32.xlu0 %v2672_v15  ;;  %v2702_v10 = vsel %vm2584_vm0, %v6529_v38, 0.0  ;;  %v6532_v15 = vld [vmem:[#allocation88_spill] sm:$0xff]  ;;  %v6548_v38 = vld [vmem:[#allocation9_spill] sm:$0xff] }
 0x19e   :  { %2694 = vadd.xlane.f32.xlu1 %v2693_v46  ;;  %v6531_v46 = vld [vmem:[#allocation89_spill] sm:$0xff] }
 0x19f   :  { %v6533_v6 = vcombine.low %v6531_v46, %v6532_v15 }
 0x1a1   :  { %2679 = vadd.xlane.f32.xlu0 %v2678_v40  ;;  %v2708_v54 = vsel %vm2584_vm0, %v6533_v6, 0.0 }
 0x1a2   :  { %2700 = vadd.xlane.f32.xlu1 %v2699_v34  ;;  %v6534_v34 = vcombine.high %v4298_v7, %v4291_v63  ;;  %v6542_v63 = vld [vmem:[#allocation14_spill] sm:$0xff]  ;;  %v6543_v7 = vld [vmem:[#allocation12_spill] sm:$0xff] }
 0x1a3   :  { %v457_v31 = vcombine.high %v6543_v7, %v6542_v63  ;;  %v6557_v7 = vld [vmem:[#allocation29_spill] sm:$0xff] }
 0x1a4   :  { %v2735_v40 = vsel %vm2584_vm0, %v6534_v34, 0.0  ;;  %v713_v49 = vcombine.high %v6558_v45, %v6557_v7  ;;  %v6571_v7 = vld [vmem:[#allocation19_spill] sm:$0xff]  ;;  %v6572_v45 = vld [vmem:[#allocation17_spill] sm:$0xff] }
 0x1a5   :  { %2685 = vadd.xlane.f32.xlu0 %v2684_v13 }
 0x1a6   :  { %2706 = vadd.xlane.f32.xlu1 %v2705_v20  ;;  %v6536_v20 = vld [vmem:[#allocation98_spill] sm:$0xff] }
 0x1a7   :  { %v6537_v43 = vcombine.low %v6535_v57, %v6536_v20 }
 0x1a9   :  { %2691 = vadd.xlane.f32.xlu0 %v2690_v8  ;;  %v2714_v13 = vsel %vm2584_vm0, %v6537_v43, 0.0  ;;  %v6554_v43 = vcombine.high %v6511_v12, %v6512_v42  ;;  %v6559_v42 = vld [vmem:[#allocation23_spill] sm:$0xff] }
 0x1aa   :  { %2712 = vadd.xlane.f32.xlu1 %v2711_v5  ;;  %v6540_v5 = vld [vmem:[#allocation110_spill] sm:$0xff] }
 0x1ab   :  { %v6541_v33 = vcombine.low %v6539_v37, %v6540_v5 }
 0x1ad   :  { %2697 = vadd.xlane.f32.xlu0 %v2696_v4  ;;  %v2720_v8 = vsel %vm2584_vm0, %v6541_v33, 0.0  ;;  %v6546_v4 = vld [vmem:[#allocation6_spill] sm:$0xff]  ;;  %v6555_v33 = vld [vmem:[#allocation27_spill] sm:$0xff] }
 0x1ae   :  { %2718 = vadd.xlane.f32.xlu1 %v2717_v24  ;;  %v6544_v24 = vcombine.high %v6505_v28, %v6506_v53  ;;  %v409_v51 = vcombine.high %v6546_v4, %v6545_v52  ;;  %v5179_v28 = vrot.slane %v457_v31, %v4104_v14  ;;  %v6551_v53 = vld [vmem:[#allocation32_spill] sm:$0xff]  ;;  %v6561_v52 = vcombine.high %v6514_v61, %v6515_v55 }
 0x1af   :  { %v6564_v61 = vld [vmem:[#allocation16_spill] sm:$0xff]  ;;  %v5415_v62 = vpop.xlane.xlu0 %2586 }
 0x1b0   :  { %v2747_v18 = vsel %vm2584_vm0, %v6544_v24, 0.0  ;;  %v5192_v44 = vrot.slane %v409_v51, %v4104_v14  ;;  %v6560_v24 = vld [vmem:[#allocation21_spill] sm:$0xff]  ;;  %v2759_v4 = vsel %vm2584_vm0, %v6561_v52, 0.0  ;;  %v6562_v51 = vcombine.high %v6517_v58, %v6518_v29 }
 0x1b1   :  { %2703 = vadd.xlane.f32.xlu0 %v2702_v10  ;;  %v6575_v52 = vcombine.high %v4966_v11, %v4960_v23  ;;  %v6579_v23 = vld [vmem:[#allocation39_spill] sm:$0xff]  ;;  %v6580_v11 = vld [vmem:[#allocation38_spill] sm:$0xff] }
 0x1b2   :  { %2724 = vadd.xlane.f32.xlu1 %v2723_v16  ;;  %v6547_v16 = vld [vmem:[#allocation11_spill] sm:$0xff] }
 0x1b3   :  { %v441_v10 = vcombine.high %v6548_v38, %v6547_v16  ;;  %v2738_v16 = vsel %vm2584_vm0, %v6562_v51, 0.0  ;;  %v6576_v51 = vcombine.high %v6527_v17, %v6528_v50  ;;  %v6581_v17 = vld [vmem:[#allocation43_spill] sm:$0xff]  ;;  %v6582_v50 = vld [vmem:[#allocation42_spill] sm:$0xff] }
 0x1b5   :  { %2709 = vadd.xlane.f32.xlu0 %v2708_v54  ;;  %v6552_v54 = vld [vmem:[#allocation30_spill] sm:$0xff] }
 0x1b6   :  { %2730 = vadd.xlane.f32.xlu1 %v2729_v3  ;;  %v6550_v3 = vld [vmem:[#allocation8_spill] sm:$0xff]  ;;  %v729_v34 = vcombine.high %v6552_v54, %v6551_v53 }
 0x1b7   :  { %v425_v6 = vcombine.high %v6550_v3, %v6549_v27  ;;  %v5225_v27 = vrot.slane %v713_v49, %v4104_v14  ;;  %v6563_v3 = vld [vmem:[#allocation18_spill] sm:$0xff]  ;;  %v6566_v53 = vld [vmem:[#allocation20_spill] sm:$0xff]  ;;  %v577_v49 = vcombine.high %v6572_v45, %v6571_v7  ;;  %v6585_v7 = vld [vmem:[#allocation37_spill] sm:$0xff] }
 0x1b8   :  { %v561_v55 = vcombine.high %v6564_v61, %v6563_v3  ;;  %v6586_v45 = vld [vmem:[#allocation35_spill] sm:$0xff] }
 0x1b9   :  { %2715 = vadd.xlane.f32.xlu0 %v2714_v13  ;;  %v2732_v13 = vsel %vm2584_vm0, %v6554_v43, 0.0  ;;  %v5202_v31 = vrot.slane %v425_v6, %v4104_v14  ;;  %v6565_v6 = vld [vmem:[#allocation22_spill] sm:$0xff]  ;;  %v6568_v43 = vcombine.high %v6523_v32, %v6524_v2  ;;  %v5281_v61 = vrot.slane %v577_v49, %v4104_v14 }
 0x1ba   :  { %2736 = vadd.xlane.f32.xlu1 %v2735_v40  ;;  %v2753_v40 = vsel %vm2584_vm0, %v6553_v35, 0.0  ;;  %v593_v54 = vcombine.high %v6566_v53, %v6565_v6  ;;  %v6567_v35 = vcombine.high %v6520_v9, %v6521_v0  ;;  %v5257_v0 = vrot.slane %v561_v55, %v4104_v14  ;;  %v6577_v55 = vld [vmem:[#allocation36_spill] sm:$0xff]  ;;  %v6578_v6 = vld [vmem:[#allocation34_spill] sm:$0xff] }
 0x1bb   :  { %v488_v38 = vcombine.low %v5192_v44, %v5202_v31  ;;  %v833_v53 = vcombine.high %v6578_v6, %v6577_v55  ;;  %v849_v49 = vcombine.high %v6586_v45, %v6585_v7 }
 0x1bc   :  { %v5260_v32 = vrot.slane %v593_v54, %v4104_v14  ;;  %v865_v54 = vcombine.high %v6580_v11, %v6579_v23  ;;  %v6590_v11 = vcombine.high %v6535_v57, %v6536_v20  ;;  %v6595_v57 = vld [vmem:[#allocation47_spill] sm:$0xff]  ;;  %v6596_v20 = vld [vmem:[#allocation44_spill] sm:$0xff] }
 0x1bd   :  { %2721 = vadd.xlane.f32.xlu0 %v2720_v8  ;;  %v6556_v8 = vld [vmem:[#allocation24_spill] sm:$0xff]  ;;  %v1089_v7 = vcombine.high %v6596_v20, %v6595_v57  ;;  %v6605_v20 = vld [vmem:[#allocation62_spill] sm:$0xff] }
 0x1be   :  { %2742 = vadd.xlane.f32.xlu1 %v2741_v47  ;;  %v5195_v47 = vrot.slane %v441_v10, %v4104_v14  ;;  %v697_v63 = vcombine.high %v6556_v8, %v6555_v33  ;;  %v6569_v33 = vld [vmem:[#allocation15_spill] sm:$0xff]  ;;  %v6570_v8 = vld [vmem:[#allocation13_spill] sm:$0xff]  ;;  %v6604_v57 = vld [vmem:[#allocation68_spill] sm:$0xff] }
 0x1c0   :  { %v520_v12 = vcombine.low %v5195_v47, %v5179_v28  ;;  %v5222_v10 = vrot.slane %v697_v63, %v4104_v14  ;;  %v545_v63 = vcombine.high %v6570_v8, %v6569_v33  ;;  %v6584_v33 = vld [vmem:[#allocation31_spill] sm:$0xff] }
 0x1c1   :  { %2727 = vadd.xlane.f32.xlu0 %v2726_v41  ;;  %v5209_v41 = vrot.slane %v729_v34, %v4104_v14 }
 0x1c2   :  { %2748 = vadd.xlane.f32.xlu1 %v2747_v18  ;;  %v681_v18 = vcombine.high %v6560_v24, %v6559_v42  ;;  %v5232_v58 = vrot.slane %v520_v12, %v4148_v36  ;;  %v5252_v12 = vrot.slane %v488_v38, %v4148_v36  ;;  %v6573_v42 = vld [vmem:[#allocation46_spill] sm:$0xff]  ;;  %v6574_v24 = vld [vmem:[#allocation45_spill] sm:$0xff]  ;;  %v5278_v3 = vrot.slane %v545_v63, %v4104_v14 }
 0x1c3   :  { %v792_v34 = vcombine.low %v5225_v27, %v5209_v41 }
 0x1c4   :  { %v5235_v29 = vrot.slane %v681_v18, %v4104_v14  ;;  %v540_v2 = vcombine.low %v5252_v12, %v5232_v58  ;;  %v1064_v18 = vcombine.low %v6574_v24, %v6573_v42  ;;  %v6587_v42 = vcombine.high %v6531_v46, %v6532_v15  ;;  %v6588_v15 = vld [vmem:[#allocation55_spill] sm:$0xff] }
 0x1c5   :  { %2733 = vadd.xlane.f32.xlu0 %v2732_v13  ;;  %v2744_v13 = vsel %vm2584_vm0, %v6568_v43, 0.0  ;;  %v5275_v38 = vrot.slane %v792_v34, %v4148_v36  ;;  %v656_v43 = vcombine.low %v5281_v61, %v5260_v32 }
 0x1c6   :  { %2754 = vadd.xlane.f32.xlu1 %v2753_v40  ;;  %v2765_v40 = vsel %vm2584_vm0, %v6567_v35, 0.0  ;;  %v760_v9 = vcombine.low %v5235_v29, %v5222_v10  ;;  %v1032_v35 = vcombine.low %v6582_v50, %v6581_v17  ;;  %v2777_v63 = vsel %vm2584_vm0, %v540_v2, 0.0 }
 0x1c7   :  { %v5314_v2 = vrot.slane %v865_v54, %v4104_v14  ;;  %v5328_v6 = vrot.slane %v656_v43, %v4148_v36  ;;  %v2762_v54 = vsel %vm2584_vm0, %v6590_v11, 0.0  ;;  %v6600_v11 = vld [vmem:[#allocation65_spill] sm:$0xff] }
 0x1c8   :  { %v5290_v34 = vrot.slane %v760_v9, %v4148_v36  ;;  %v2756_v9 = vsel %vm2584_vm0, %v6587_v42, 0.0  ;;  %v6597_v42 = vld [vmem:[#allocation71_spill] sm:$0xff] }
 0x1c9   :  { %2739 = vadd.xlane.f32.xlu0 %v2738_v16  ;;  %v2750_v16 = vsel %vm2584_vm0, %v6576_v51, 0.0  ;;  %v5317_v51 = vrot.slane %v1032_v35, %v4148_v36  ;;  %v6591_v35 = vld [vmem:[#allocation50_spill] sm:$0xff] }
 0x1ca   :  { %2760 = vadd.xlane.f32.xlu1 %v2759_v4  ;;  %v2771_v4 = vsel %vm2584_vm0, %v6575_v52, 0.0  ;;  %v812_v24 = vcombine.low %v5290_v34, %v5275_v38  ;;  %v5308_v52 = vrot.slane %v1064_v18, %v4148_v36 }
 0x1cc   :  { %v2783_v23 = vsel %vm2584_vm0, %v812_v24, 0.0  ;;  %v1084_v17 = vcombine.low %v5317_v51, %v5308_v52 }
 0x1cd   :  { %2745 = vadd.xlane.f32.xlu0 %v2744_v13  ;;  %v6583_v13 = vld [vmem:[#allocation33_spill] sm:$0xff] }
 0x1ce   :  { %2766 = vadd.xlane.f32.xlu1 %v2765_v40  ;;  %v624_v40 = vcombine.low %v5278_v3, %v5257_v0  ;;  %v817_v8 = vcombine.high %v6584_v33, %v6583_v13  ;;  %v6593_v13 = vld [vmem:[#allocation52_spill] sm:$0xff]  ;;  %v6594_v33 = vld [vmem:[#allocation49_spill] sm:$0xff] }
 0x1d0   :  { %v5320_v46 = vrot.slane %v817_v8, %v4104_v14  ;;  %v5325_v18 = vrot.slane %v624_v40, %v4148_v36  ;;  %v6592_v40 = vld [vmem:[#allocation48_spill] sm:$0xff]  ;;  %v1121_v8 = vcombine.high %v6594_v33, %v6593_v13 }
 0x1d1   :  { %2751 = vadd.xlane.f32.xlu0 %v2750_v16  ;;  %v6589_v16 = vld [vmem:[#allocation53_spill] sm:$0xff]  ;;  %v1105_v43 = vcombine.high %v6592_v40, %v6591_v35 }
 0x1d2   :  { %2772 = vadd.xlane.f32.xlu1 %v2771_v4  ;;  %v5311_v4 = vrot.slane %v833_v53, %v4104_v14  ;;  %v1137_v55 = vcombine.high %v6589_v16, %v6588_v15  ;;  %v5331_v53 = vrot.slane %v849_v49, %v4104_v14  ;;  %v676_v49 = vcombine.low %v5325_v18, %v5328_v6 }
 0x1d3   :  { %v2789_v15 = vsel %vm2584_vm0, %v1084_v17, 0.0  ;;  %v6599_v16 = vcombine.high %v6539_v37, %v6540_v5  ;;  %v5365_v40 = vrot.slane %v1105_v43, %v4104_v14  ;;  %v5374_v17 = vrot.slane %v1089_v7, %v4104_v14  ;;  %v6602_v37 = vld [vmem:[#allocation63_spill] sm:$0xff]  ;;  %v6603_v5 = vld [vmem:[#allocation60_spill] sm:$0xff]  ;;  %v6609_v7 = vld [vmem:[#allocation82_spill] sm:$0xff] }
 0x1d4   :  { %v896_v50 = vcombine.low %v5320_v46, %v5311_v4  ;;  %v5351_v45 = vrot.slane %v1137_v55, %v4104_v14  ;;  %v5368_v55 = vrot.slane %v1121_v8, %v4104_v14  ;;  %v1377_v33 = vcombine.high %v6603_v5, %v6602_v37 }
 0x1d5   :  { %2757 = vadd.xlane.f32.xlu0 %v2756_v9  ;;  %v6598_v9 = vld [vmem:[#allocation69_spill] sm:$0xff]  ;;  %v1665_v37 = vcombine.high %v6611_v1, %v6610_v56  ;;  %v6616_v1 = vld [vmem:[#allocation78_spill] sm:$0xff]  ;;  %v6617_v56 = vld [vmem:[#allocation75_spill] sm:$0xff] }
 0x1d6   :  { %2778 = vadd.xlane.f32.xlu1 %v2777_v63  ;;  %v928_v63 = vcombine.low %v5331_v53, %v5314_v2  ;;  %v1409_v24 = vcombine.high %v6598_v9, %v6597_v42  ;;  %v5371_v13 = vrot.slane %v896_v50, %v4148_v36  ;;  %v1393_v42 = vcombine.high %v6605_v20, %v6604_v57  ;;  %v5380_v9 = vpop.xlane.xlu1 %2589  ;;  %v6607_v50 = vld [vmem:[#allocation58_spill] sm:$0xff]  ;;  %v6612_v20 = vld [vmem:[#allocation80_spill] sm:$0xff] }
 0x1d7   :  { %v1200_v8 = vcombine.low %v5368_v55, %v5351_v45  ;;  %v1628_v21 = vcombine.low %v6613_v59, %v6612_v20  ;;  %v6626_v59 = vlaneseq }
 0x1d8   :  { %v5383_v43 = vrot.slane %v928_v63, %v4148_v36  ;;  %v5394_v5 = vrot.slane %v1409_v24, %v4104_v14  ;;  %v2774_v63 = vsel %vm2584_vm0, %v2579_v26, 0.0  ;;  %v1633_v24 = vcombine.high %v6617_v56, %v6616_v1  ;;  %v6621_v1 = vld [vmem:[#allocation97_spill] sm:$0xff] }
 0x1d9   :  { %2763 = vadd.xlane.f32.xlu0 %v2762_v54  ;;  %v6601_v54 = vld [vmem:[#allocation66_spill] sm:$0xff]  ;;  %v5413_v22 = vrot.slane %v1393_v42, %v4104_v14  ;;  %v2780_v26 = vsel %vm2584_vm0, %v676_v49, 0.0 }
 0x1da   :  { %2784 = vadd.xlane.f32.xlu1 %v2783_v23  ;;  %v2768_v23 = vsel %vm2584_vm0, %v6599_v16, 0.0  ;;  %v1356_v35 = vcombine.low %v6601_v54, %v6600_v11  ;;  %v6620_v49 = vld [vmem:[#allocation94_spill] sm:$0xff]  ;;  %v5443_v48 = vrot.slane %v1633_v24, %v4104_v14  ;;  %v6628_v11 = vld [vmem:[#allocation96_spill] sm:$0xff]  ;;  %v541_v54 = vcombine.high %v5252_v12, %v5232_v58 }
 0x1db   :  { %v1472_v42 = vcombine.low %v5413_v22, %v5394_v5  ;;  %v6624_v24 = vld [vmem:[#allocation106_spill] sm:$0xff] }
 0x1dc   :  { %v2795_v57 = vsel %vm2584_vm0, %v1356_v35, 0.0  ;;  %v5410_v35 = vrot.slane %v1377_v33, %v4104_v14  ;;  %6623 = vst [vmem:[#allocation76_spill] sm:$0xff] %v5443_v48 }
 0x1dd   :  { %2769 = vadd.xlane.f32.xlu0 %v2768_v23  ;;  %v6608_v23 = vld [vmem:[#allocation86_spill] sm:$0xff] }
 0x1de   :  { %2790 = vadd.xlane.f32.xlu1 %v2789_v15  ;;  %v6606_v15 = vld [vmem:[#allocation59_spill] sm:$0xff]  ;;  %v1681_v30 = vcombine.high %v6609_v7, %v6608_v23  ;;  %v6615_v23 = vld [vmem:[#allocation74_spill] sm:$0xff] }
 0x1df   :  { %v1361_v16 = vcombine.high %v6607_v50, %v6606_v15  ;;  %v1168_v15 = vcombine.low %v5374_v17, %v5365_v40  ;;  %v6614_v50 = vld [vmem:[#allocation77_spill] sm:$0xff] }
 0x1e0   :  { %v1649_v7 = vcombine.high %v6615_v23, %v6614_v50  ;;  %v5419_v25 = vrot.slane %v1681_v30, %v4104_v14  ;;  %v5422_v50 = vrot.slane %v1665_v37, %v4104_v14  ;;  %v5434_v23 = vpop.xlane.xlu1 %2598  ;;  %v2801_v30 = vsel %vm2584_vm0, %v1628_v21, 0.0 }
 0x1e1   :  { %2775 = vadd.xlane.f32.xlu0 %v2774_v63  ;;  %v5427_v63 = vrot.slane %v1200_v8, %v4148_v36  ;;  %v5430_v33 = vrot.slane %v1361_v16, %v4104_v14  ;;  %v1900_v37 = vcombine.low %v6621_v1, %v6620_v49  ;;  %v5446_v8 = vrot.slane %v1168_v15, %v4148_v36  ;;  %v5454_v1 = vpop.xlane.xlu0 %2592 }
 0x1e2   :  { %2796 = vadd.xlane.f32.xlu1 %v2795_v57  ;;  %6618 = vst [vmem:[#allocation64_spill] sm:$0xff] %v5419_v25  ;;  %6619 = vst [vmem:[#allocation61_spill] sm:$0xff] %v5422_v50  ;;  %v948_v57 = vcombine.low %v5371_v13, %v5383_v43  ;;  %v5440_v56 = vrot.slane %v1649_v7, %v4104_v14  ;;  %v1744_v21 = vcombine.low %v5422_v50, %v5419_v25 }
 0x1e3   :  { %v1440_v16 = vcombine.low %v5430_v33, %v5410_v35  ;;  %v1220_v49 = vcombine.low %v5446_v8, %v5427_v63  ;;  %v2807_v7 = vsel %vm2584_vm0, %v1900_v37, 0.0  ;;  %v5461_v15 = vrot.slane %v1472_v42, %v4148_v36 }
 0x1e4   :  { %6622 = vst [vmem:[#allocation79_spill] sm:$0xff] %v5440_v56  ;;  %v2786_v14 = vsel %vm2584_vm0, %v948_v57, 0.0  ;;  %v1712_v20 = vcombine.low %v5443_v48, %v5440_v56  ;;  %v5466_v50 = vand.u32 127, %v6626_v59  ;;  %v5468_v25 = vpop.xlane.xlu1 %2604  ;;  %v5476_v42 = vrot.slane %v1744_v21, %v4148_v36 }
 0x1e5   :  { %2781 = vadd.xlane.f32.xlu0 %v2780_v26  ;;  %v6625_v26 = vld [vmem:[#allocation107_spill] sm:$0xff]  ;;  %v5471_v37 = vrot.slane %v1440_v16, %v4148_v36  ;;  %v489_v16 = vcombine.high %v5192_v44, %v5202_v31  ;;  %v625_v44 = vcombine.high %v5278_v3, %v5257_v0 }
 0x1e6   :  { %2802 = vadd.xlane.f32.xlu1 %v2801_v30  ;;  %v2172_v30 = vcombine.low %v6625_v26, %v6624_v24  ;;  %v3103_v57 = vadd.s32 4294967288, %v5466_v50  ;;  %v2792_v24 = vsel %vm2584_vm0, %v1220_v49, 0.0  ;;  %v6627_v26 = vld [vmem:[#allocation95_spill] sm:$0xff]  ;;  %v521_v49 = vcombine.high %v5195_v47, %v5179_v28  ;;  %v6632_v28 = vld [vmem:[#allocation5_spill] sm:$0xff] }
 0x1e7   :  { %v2016_v48 = vcombine.low %v6628_v11, %v6627_v26  ;;  %v1492_v56 = vcombine.low %v5471_v37, %v5461_v15  ;;  %v5490_v21 = vrot.slane %v1712_v20, %v4148_v36  ;;  %v657_v11 = vcombine.high %v5281_v61, %v5260_v32  ;;  %v6630_v26 = vld [vmem:[#allocation92_spill] sm:$0xff] }
 0x1e8   :  { %v2813_v59 = vsel %vm2584_vm0, %v2172_v30, 0.0  ;;  %v6631_v30 = vld [vmem:[#allocation93_spill] sm:$0xff]  ;;  %v5503_v47 = vsub.s32 %v3103_v57, %v6632_v28  ;;  %v3110_v20 = vadd.s32 4294967280, %v5466_v50  ;;  %v5508_v32 = vpop.xlane.xlu1 %2610  ;;  %v5517_v58 = vsub.s32 %v5466_v50, %v6632_v28 }
 0x1e9   :  { %2787 = vadd.xlane.f32.xlu0 %v2786_v14  ;;  %v1764_v31 = vcombine.low %v5490_v21, %v5476_v42  ;;  %v3117_v12 = vadd.s32 4294967272, %v5466_v50  ;;  %v5521_v0 = vrot.slane %v489_v16, %v4148_v36  ;;  %v5524_v3 = vrot.slane %v521_v49, %v4148_v36 }
 0x1ea   :  { %2808 = vadd.xlane.f32.xlu1 %v2807_v7  ;;  %v6629_v7 = vld [vmem:[#allocation119_spill] sm:$0xff]  ;;  %v813_v49 = vcombine.high %v5290_v34, %v5275_v38  ;;  %v3131_v34 = vadd.s32 4294967256, %v5466_v50 }
 0x1eb   :  { %v2444_v14 = vcombine.low %v6629_v7, %v4969_v19  ;;  %v1984_v19 = vcombine.low %v6631_v30, %v6630_v26  ;;  %v5496_v7 = vpop.xlane.xlu0 %2595  ;;  %v3107_v26 = vrot.slane %v5380_v9, %v5503_v47  ;;  %v2804_v16 = vsel %vm2584_vm0, %v1764_v31, 0.0 }
 0x1ec   :  { %v5541_v30 = vrot.slane %v625_v44, %v4148_v36  ;;  %v761_v9 = vcombine.high %v5235_v29, %v5222_v10  ;;  %v5554_v38 = vsub.s32 %v3117_v12, %v6632_v28  ;;  %v5557_v44 = vpop.xlane.xlu1 %2616  ;;  %v542_v10 = vcombine.low %v5521_v0, %v5524_v3 }
 0x1ed   :  { %2793 = vadd.xlane.f32.xlu0 %v2792_v24  ;;  %v2819_v61 = vsel %vm2584_vm0, %v2444_v14, 0.0  ;;  %v2798_v24 = vsel %vm2584_vm0, %v1492_v56, 0.0  ;;  %v793_v56 = vcombine.high %v5225_v27, %v5209_v41  ;;  %v5530_v57 = vrot.slane %v1984_v19, %v4148_v36 }
 0x1ee   :  { %2814 = vadd.xlane.f32.xlu1 %v2813_v59  ;;  %v5513_v59 = vrot.slane %v2016_v48, %v4148_v36  ;;  %v2825_v48 = vsel %vm2584_vm0, %v541_v54, 0.0  ;;  %v5533_v14 = vrot.slane %v657_v11, %v4148_v36  ;;  %v5544_v41 = vsub.s32 %v3110_v20, %v6632_v28 }
 0x1ef   :  { %6634 = vst [vmem:[#allocation25_spill] sm:$0xff] %v5530_v57  ;;  %v3124_v19 = vadd.s32 4294967264, %v5466_v50  ;;  %v2602_v27 = vpop.xlane.xlu0 %2601  ;;  %v3102_v11 = vrot.slane %v5415_v62, %v5517_v58  ;;  %v5562_v20 = vrot.slane %v793_v56, %v4148_v36  ;;  %v3138_v62 = vadd.s32 4294967248, %v5466_v50  ;;  %v6635_v56 = vld [vmem:[#allocation112_spill] sm:$0xff] }
 0x1f0   :  { %6633 = vst [vmem:[#allocation28_spill] sm:$0xff] %v5513_v59  ;;  %v2036_v54 = vcombine.low %v5530_v57, %v5513_v59  ;;  %v678_v31 = vcombine.low %v5541_v30, %v5533_v14  ;;  %v3121_v59 = vrot.slane %v5496_v7, %v5554_v38 }
 0x1f1   :  { %2799 = vadd.xlane.f32.xlu0 %v2798_v24  ;;  %v3109_v29 = vsel %vm3108_vm1, %v3107_v26, %v3102_v11  ;;  %v3114_v24 = vrot.slane %v5454_v1, %v5544_v41  ;;  %v5572_v12 = vsub.s32 %v3124_v19, %v6632_v28  ;;  %v5580_v26 = vsub.s32 %v3131_v34, %v6632_v28 }
 0x1f2   :  { %2820 = vadd.xlane.f32.xlu1 %v2819_v61  ;;  %v2831_v61 = vsel %vm2584_vm0, %v813_v49, 0.0  ;;  %v3145_v11 = vadd.s32 4294967240, %v5466_v50  ;;  %v5584_v1 = vrot.slane %v761_v9, %v4148_v36  ;;  %v897_v49 = vcombine.high %v5320_v46, %v5311_v4 }
 0x1f3   :  { %v3116_v19 = vsel %vm3115_vm2, %v3114_v24, %v3109_v29  ;;  %v2876_v7 = vsel %vm2584_vm0, %v678_v31, 0.0  ;;  %v929_v34 = vcombine.high %v5331_v53, %v5314_v2  ;;  %v3128_v4 = vrot.slane %v5434_v23, %v5572_v12 }
 0x1f4   :  { %v814_v9 = vcombine.low %v5584_v1, %v5562_v20  ;;  %v3152_v46 = vadd.s32 4294967232, %v5466_v50  ;;  %v2580_v31 = vcombine.low %v5028_v39, %v5022_v60  ;;  %v3123_v24 = vsel %vm3122_vm3, %v3121_v59, %v3116_v19 }
 0x1f5   :  { %2805 = vadd.xlane.f32.xlu0 %v2804_v16  ;;  %v6636_v16 = vld [vmem:[#allocation114_spill] sm:$0xff]  ;;  %v3135_v2 = vrot.slane %v2602_v27, %v5580_v26  ;;  %v5608_v53 = vsub.s32 %v3145_v11, %v6632_v28  ;;  %v5618_v59 = vrot.slane %v897_v49, %v4148_v36  ;;  %v3166_v27 = vadd.s32 4294967216, %v5466_v50 }
 0x1f6   :  { %2826 = vadd.xlane.f32.xlu1 %v2825_v48  ;;  %v2810_v48 = vsel %vm2584_vm0, %v2036_v54, 0.0  ;;  %v2308_v57 = vcombine.low %v6636_v16, %v6635_v56  ;;  %v2608_v54 = vpop.xlane.xlu0 %2607  ;;  %v5589_v56 = vpop.xlane.xlu1 %2622  ;;  %v2879_v11 = vsel %vm2584_vm0, %v814_v9, 0.0  ;;  %v5623_v19 = vrot.slane %v929_v34, %v4148_v36 }
 0x1f7   :  { %v3149_v49 = vrot.slane %v2608_v54, %v5608_v53  ;;  %v3173_v34 = vadd.s32 4294967208, %v5466_v50 }
 0x1f8   :  { %v2816_v29 = vsel %vm2584_vm0, %v2308_v57, 0.0  ;;  %v679_v57 = vcombine.high %v5541_v30, %v5533_v14  ;;  %v5629_v14 = vsub.s32 %v3152_v46, %v6632_v28  ;;  %v2873_v46 = vsel %vm2584_vm0, %v542_v10, 0.0 }
 0x1f9   :  { %2811 = vadd.xlane.f32.xlu0 %v2810_v48  ;;  %v677_v48 = vcombine.high %v5325_v18, %v5328_v6  ;;  %v2822_v6 = vsel %vm2584_vm0, %v2580_v31, 0.0  ;;  %v3187_v31 = vadd.s32 4294967192, %v5466_v50  ;;  %v3194_v10 = vadd.s32 4294967184, %v5466_v50 }
 0x1fa   :  { %2832 = vadd.xlane.f32.xlu1 %v2831_v61  ;;  %v5595_v61 = vsub.s32 %v3138_v62, %v6632_v28  ;;  %v3159_v62 = vadd.s32 4294967224, %v5466_v50  ;;  %v2614_v18 = vpop.xlane.xlu0 %2613 }
 0x1fb   :  { %v2828_v54 = vsel %vm2584_vm0, %v677_v48, 0.0  ;;  %v5657_v48 = vsub.s32 %v3173_v34, %v6632_v28 }
 0x1fc   :  { %v5635_v9 = vsub.s32 %v3159_v62, %v6632_v28 }
 0x1fd   :  { %2817 = vadd.xlane.f32.xlu0 %v2816_v29  ;;  %v3142_v29 = vrot.slane %v5468_v25, %v5595_v61  ;;  %v3180_v25 = vadd.s32 4294967200, %v5466_v50 }
 0x1fe   :  { %2877 = vadd.xlane.f32.xlu1 %v2876_v7  ;;  %v3130_v7 = vsel %vm3129_vm4, %v3128_v4, %v3123_v24  ;;  %v2924_v24 = vsel %vm2584_vm0, %v679_v57, 0.0  ;;  %v3163_v57 = vrot.slane %v2614_v18, %v5635_v9  ;;  %v1201_v18 = vcombine.high %v5368_v55, %v5351_v45 }
 0x1ff   :  { %v5611_v23 = vpop.xlane.xlu1 %2628  ;;  %v3137_v30 = vsel %vm3136_vm5, %v3135_v2, %v3130_v7  ;;  %v950_v2 = vcombine.low %v5618_v59, %v5623_v19  ;;  %v5651_v7 = vsub.s32 %v3166_v27, %v6632_v28  ;;  %v949_v27 = vcombine.high %v5371_v13, %v5383_v43 }
 0x200   :  { %v3144_v62 = vsel %vm3143_vm6, %v3142_v29, %v3137_v30  ;;  %v5660_v29 = vsub.s32 %v3180_v25, %v6632_v28  ;;  %v543_v30 = vcombine.high %v5521_v0, %v5524_v3  ;;  %v5679_v13 = vsub.s32 %v3194_v10, %v6632_v28 }
 0x201   :  { %2823 = vadd.xlane.f32.xlu0 %v2822_v6  ;;  %v2620_v6 = vpop.xlane.xlu0 %2619  ;;  %v3151_v60 = vsel %vm3150_vm7, %v3149_v49, %v3144_v62  ;;  %v5671_v49 = vsub.s32 %v3187_v31, %v6632_v28  ;;  %v2882_v34 = vsel %vm2584_vm0, %v950_v2, 0.0  ;;  %v1221_v43 = vcombine.high %v5446_v8, %v5427_v63 }
 0x202   :  { %2880 = vadd.xlane.f32.xlu1 %v2879_v11  ;;  %v3156_v11 = vrot.slane %v5508_v32, %v5629_v14  ;;  %v3177_v55 = vrot.slane %v2620_v6, %v5657_v48  ;;  %v3184_v0 = vrot.slane %v5589_v56, %v5660_v29  ;;  %v2834_v63 = vsel %vm2584_vm0, %v949_v27, 0.0 }
 0x203   :  { %v5639_v4 = vpop.xlane.xlu1 %2634  ;;  %v2921_v27 = vsel %vm2584_vm0, %v543_v30, 0.0  ;;  %v1473_v30 = vcombine.high %v5413_v22, %v5394_v5 }
 0x204   :  { %v3158_v25 = vsel %vm3157_vm8, %v3156_v11, %v3151_v60  ;;  %v951_v60 = vcombine.high %v5618_v59, %v5623_v19 }
 0x205   :  { %2829 = vadd.xlane.f32.xlu0 %v2828_v54  ;;  %v3170_v54 = vrot.slane %v5557_v44, %v5651_v7  ;;  %v2626_v62 = vpop.xlane.xlu0 %2625  ;;  %v3165_v45 = vsel %vm3164_vm9, %v3163_v57, %v3158_v25 }
 0x206   :  { %2925 = vadd.xlane.f32.xlu1 %v2924_v24  ;;  %v3201_v24 = vadd.s32 4294967176, %v5466_v50  ;;  %v1169_v50 = vcombine.high %v5374_v17, %v5365_v40  ;;  %v3191_v8 = vrot.slane %v2626_v62, %v5671_v49  ;;  %v3198_v40 = vrot.slane %v5611_v23, %v5679_v13 }
 0x207   :  { %v5662_v32 = vpop.xlane.xlu1 %2640  ;;  %v3172_v59 = vsel %vm3171_vm10, %v3170_v54, %v3165_v45  ;;  %v2840_v17 = vsel %vm2584_vm0, %v1221_v43, 0.0  ;;  %v1085_v23 = vcombine.high %v5317_v51, %v5308_v52  ;;  %v2930_v57 = vsel %vm2584_vm0, %v951_v60, 0.0 }
 0x208   :  { %v5694_v44 = vsub.s32 %v3201_v24, %v6632_v28  ;;  %v3179_v56 = vsel %vm3178_vm11, %v3177_v55, %v3172_v59  ;;  %v1183_v2 = vrot.slane %v1169_v50, %v4148_v36  ;;  %v3211_v54 = vrot.slane %v5639_v4, %v5517_v58 }
 0x209   :  { %2874 = vadd.xlane.f32.xlu0 %v2873_v46  ;;  %v1215_v46 = vrot.slane %v1201_v18, %v4148_v36  ;;  %v3186_v19 = vsel %vm6334_vm12, %v3184_v0, %v3179_v56  ;;  %v2837_v52 = vsel %vm2584_vm0, %v1085_v23, 0.0  ;;  %v815_v51 = vcombine.high %v5584_v1, %v5562_v20  ;;  %v6637_v56 = vld [vmem:[#allocation54_spill] sm:$0xff] }
 0x20a   :  { %2883 = vadd.xlane.f32.xlu1 %v2882_v34  ;;  %v3193_v11 = vsel %vm3192_vm13, %v3191_v8, %v3186_v19  ;;  %v3220_v43 = vrot.slane %v5662_v32, %v5544_v41  ;;  %v1493_v55 = vcombine.high %v5471_v37, %v5461_v15  ;;  %v1441_v60 = vcombine.high %v5430_v33, %v5410_v35 }
 0x20b   :  { %v2647_v3 = vpop.xlane.xlu1 %2646  ;;  %v3200_v10 = vsel %vm3199_vm14, %v3198_v40, %v3193_v11  ;;  %v1222_v18 = vcombine.low %v1183_v2, %v1215_v46  ;;  %v2927_v22 = vsel %vm2584_vm0, %v815_v51, 0.0  ;;  %v1223_v15 = vcombine.high %v1183_v2, %v1215_v46  ;;  %v6638_v46 = vld [vmem:[#allocation51_spill] sm:$0xff] }
 0x20c   :  { %v3230_v32 = vrot.slane %v2647_v3, %v5572_v12  ;;  %v2846_v0 = vsel %vm2584_vm0, %v1493_v55, 0.0  ;;  %v1487_v37 = vrot.slane %v1473_v30, %v4148_v36  ;;  %v1455_v59 = vrot.slane %v1441_v60, %v4148_v36  ;;  %v6645_v55 = vld [vmem:[#allocation79_spill] sm:$0xff] }
 0x20d   :  { %2835 = vadd.xlane.f32.xlu0 %v2834_v63  ;;  %v2888_v45 = vsel %vm2584_vm0, %v1222_v18, 0.0  ;;  %v2936_v3 = vsel %vm2584_vm0, %v1223_v15, 0.0  ;;  %v6639_v19 = vcombine.low %v6637_v56, %v6638_v46 }
 0x20e   :  { %2841 = vadd.xlane.f32.xlu1 %v2840_v17  ;;  %v2632_v28 = vpop.xlane.xlu0 %2631  ;;  %v1494_v2 = vcombine.low %v1455_v59, %v1487_v37 }
 0x20f   :  { %v2653_v31 = vpop.xlane.xlu1 %2652  ;;  %v3205_v6 = vrot.slane %v2632_v28, %v5694_v44  ;;  %v2885_v28 = vsel %vm2584_vm0, %v6639_v19, 0.0 }
 0x210   :  { %v3240_v17 = vrot.slane %v2653_v31, %v5595_v61  ;;  %v6641_v31 = vld [vmem:[#allocation65_spill] sm:$0xff]  ;;  %v2894_v30 = vsel %vm2584_vm0, %v1494_v2, 0.0 }
 0x211   :  { %v5712_v34 = vsel %vm3206_vm15, %v3205_v6, %v3200_v10  ;;  %2922 = vadd.xlane.f32.xlu0 %v2921_v27  ;;  %v6640_v27 = vld [vmem:[#allocation66_spill] sm:$0xff] }
 0x212   :  { %2931 = vadd.xlane.f32.xlu1 %v2930_v57  ;;  %v2638_v25 = vpop.xlane.xlu0 %2637  ;;  %v6642_v18 = vcombine.high %v6640_v27, %v6641_v31  ;;  %v6651_v27 = vld [vmem:[#allocation84_spill] sm:$0xff] }
 0x213   :  { %v2659_v24 = vpop.xlane.xlu1 %2658  ;;  %v3215_v62 = vrot.slane %v2638_v25, %v5503_v47  ;;  %v6652_v31 = vld [vmem:[#allocation80_spill] sm:$0xff] }
 0x214   :  { %v2843_v25 = vsel %vm2584_vm0, %v6642_v18, 0.0  ;;  %v3250_v51 = vrot.slane %v2659_v24, %v5629_v14  ;;  %v6647_v24 = vcombine.high %v6637_v56, %v6638_v46  ;;  %v6648_v46 = vld [vmem:[#allocation70_spill] sm:$0xff]  ;;  %v6653_v18 = vcombine.high %v6651_v27, %v6652_v31 }
 0x215   :  { %v3216_v4 = vsel %vm3108_vm1, %v3215_v62, %v3211_v54  ;;  %2838 = vadd.xlane.f32.xlu0 %v2837_v52  ;;  %v6643_v54 = vld [vmem:[#allocation64_spill] sm:$0xff]  ;;  %v6644_v62 = vld [vmem:[#allocation61_spill] sm:$0xff] }
 0x216   :  { %2889 = vadd.xlane.f32.xlu1 %v2888_v45  ;;  %v3221_v20 = vsel %vm3115_vm2, %v3220_v43, %v3216_v4  ;;  %v2644_v1 = vpop.xlane.xlu0 %2643  ;;  %v1745_v52 = vcombine.high %v6644_v62, %v6643_v54  ;;  %v1765_v43 = vcombine.high %v5490_v21, %v5476_v42  ;;  %v6646_v4 = vld [vmem:[#allocation76_spill] sm:$0xff]  ;;  %v6655_v62 = vld [vmem:[#allocation25_spill] sm:$0xff] }
 0x217   :  { %v2665_v50 = vpop.xlane.xlu1 %2664  ;;  %v3225_v5 = vrot.slane %v2644_v1, %v5554_v38  ;;  %v1713_v60 = vcombine.high %v6646_v4, %v6645_v55  ;;  %v6654_v54 = vld [vmem:[#allocation28_spill] sm:$0xff] }
 0x218   :  { %v3260_v42 = vrot.slane %v2665_v50, %v5651_v7  ;;  %v2852_v21 = vsel %vm2584_vm0, %v1765_v43, 0.0  ;;  %v1759_v15 = vrot.slane %v1745_v52, %v4148_v36  ;;  %v2037_v52 = vcombine.high %v6655_v62, %v6654_v54 }
 0x219   :  { %v3226_v63 = vsel %vm3122_vm3, %v3225_v5, %v3221_v20  ;;  %2928 = vadd.xlane.f32.xlu0 %v2927_v22 }
 0x21a   :  { %2847 = vadd.xlane.f32.xlu1 %v2846_v0  ;;  %v3231_v33 = vsel %vm3129_vm4, %v3230_v32, %v3226_v63  ;;  %v2650_v8 = vpop.xlane.xlu0 %2649  ;;  %v2933_v32 = vsel %vm2584_vm0, %v6647_v24, 0.0  ;;  %v1495_v0 = vcombine.high %v1455_v59, %v1487_v37  ;;  %v6649_v37 = vld [vmem:[#allocation67_spill] sm:$0xff]  ;;  %v2858_v55 = vsel %vm2584_vm0, %v2037_v52, 0.0 }
 0x21b   :  { %v2671_v35 = vpop.xlane.xlu1 %2670  ;;  %v3235_v40 = vrot.slane %v2650_v8, %v5580_v26  ;;  %v6650_v59 = vcombine.low %v6648_v46, %v6649_v37  ;;  %v6656_v4 = vcombine.high %v6648_v46, %v6649_v37  ;;  %v6661_v37 = vld [vmem:[#allocation100_spill] sm:$0xff] }
 0x21c   :  { %v3270_v56 = vrot.slane %v2671_v35, %v5660_v29  ;;  %v2942_v50 = vsel %vm2584_vm0, %v1495_v0, 0.0 }
 0x21d   :  { %v3236_v11 = vsel %vm3136_vm5, %v3235_v40, %v3231_v33  ;;  %2886 = vadd.xlane.f32.xlu0 %v2885_v28  ;;  %v2891_v19 = vsel %vm2584_vm0, %v6650_v59, 0.0 }
 0x21e   :  { %2937 = vadd.xlane.f32.xlu1 %v2936_v3  ;;  %v3241_v23 = vsel %vm3143_vm6, %v3240_v17, %v3236_v11  ;;  %v2656_v10 = vpop.xlane.xlu0 %2655  ;;  %v1727_v17 = vrot.slane %v1713_v60, %v4148_v36  ;;  %v2939_v60 = vsel %vm2584_vm0, %v6656_v4, 0.0 }
 0x21f   :  { %v2677_v6 = vpop.xlane.xlu1 %2676  ;;  %v3245_v57 = vrot.slane %v2656_v10, %v5608_v53 }
 0x220   :  { %v1766_v28 = vcombine.low %v1727_v17, %v1759_v15  ;;  %v3280_v35 = vrot.slane %v2677_v6, %v5679_v13 }
 0x221   :  { %v3246_v45 = vsel %vm3150_vm7, %v3245_v57, %v3241_v23  ;;  %2844 = vadd.xlane.f32.xlu0 %v2843_v25  ;;  %v2849_v25 = vsel %vm2584_vm0, %v6653_v18, 0.0  ;;  %v6666_v18 = vld [vmem:[#allocation112_spill] sm:$0xff] }
 0x222   :  { %2895 = vadd.xlane.f32.xlu1 %v2894_v30  ;;  %v3251_v1 = vsel %vm3157_vm8, %v3250_v51, %v3246_v45  ;;  %v2662_v5 = vpop.xlane.xlu0 %2661  ;;  %v2900_v57 = vsel %vm2584_vm0, %v1766_v28, 0.0  ;;  %v6663_v28 = vld [vmem:[#allocation97_spill] sm:$0xff] }
 0x223   :  { %v2683_v20 = vpop.xlane.xlu1 %2682  ;;  %v3255_v22 = vrot.slane %v2662_v5, %v5635_v9 }
 0x225   :  { %v3256_v63 = vsel %vm3164_vm9, %v3255_v22, %v3251_v1  ;;  %2934 = vadd.xlane.f32.xlu0 %v2933_v32  ;;  %v1767_v1 = vcombine.high %v1727_v17, %v1759_v15 }
 0x226   :  { %2853 = vadd.xlane.f32.xlu1 %v2852_v21  ;;  %v3261_v8 = vsel %vm3171_vm10, %v3260_v42, %v3256_v63  ;;  %v2668_v40 = vpop.xlane.xlu0 %2667  ;;  %v3290_v42 = vrot.slane %v2683_v20, %v5517_v58 }
 0x227   :  { %v2689_v33 = vpop.xlane.xlu1 %2688  ;;  %v3265_v3 = vrot.slane %v2668_v40, %v5657_v48  ;;  %v2948_v63 = vsel %vm2584_vm0, %v1767_v1, 0.0  ;;  %v6658_v40 = vld [vmem:[#allocation81_spill] sm:$0xff]  ;;  %v6671_v1 = vld [vmem:[#allocation102_spill] sm:$0xff] }
 0x228   :  { %v3299_v0 = vrot.slane %v2689_v33, %v5544_v41  ;;  %v6660_v33 = vld [vmem:[#allocation101_spill] sm:$0xff] }
 0x229   :  { %v3266_v2 = vsel %vm3178_vm11, %v3265_v3, %v3261_v8  ;;  %2892 = vadd.xlane.f32.xlu0 %v2891_v19  ;;  %v6657_v8 = vld [vmem:[#allocation85_spill] sm:$0xff]  ;;  %v6662_v59 = vcombine.low %v6660_v33, %v6661_v37 }
 0x22a   :  { %2943 = vadd.xlane.f32.xlu1 %v2942_v50  ;;  %v3271_v23 = vsel %vm6334_vm12, %v3270_v56, %v3266_v2  ;;  %v2674_v36 = vpop.xlane.xlu0 %2673  ;;  %vm3761_vm12 = vcmask 1041409   ;;  %v6659_v15 = vcombine.low %v6657_v8, %v6658_v40  ;;  %v6664_v2 = vld [vmem:[#allocation94_spill] sm:$0xff]  ;;  %v6668_v62 = vcombine.high %v6657_v8, %v6658_v40  ;;  %v6673_v40 = vld [vmem:[#allocation115_spill] sm:$0xff] }
 0x22b   :  { %v2695_v11 = vpop.xlane.xlu1 %2694  ;;  %v3275_v10 = vrot.slane %v2674_v36, %v5671_v49  ;;  %v2906_v19 = vsel %vm2584_vm0, %v6662_v59, 0.0 }
 0x22c   :  { %v2897_v17 = vsel %vm2584_vm0, %v6659_v15, 0.0  ;;  %v3309_v46 = vrot.slane %v2695_v11, %v5572_v12  ;;  %v2945_v52 = vsel %vm2584_vm0, %v6668_v62, 0.0  ;;  %v6674_v15 = vld [vmem:[#allocation113_spill] sm:$0xff] }
 0x22d   :  { %v3276_v51 = vsel %vm3192_vm13, %v3275_v10, %v3271_v23  ;;  %2850 = vadd.xlane.f32.xlu0 %v2849_v25  ;;  %v6665_v23 = vcombine.high %v6663_v28, %v6664_v2  ;;  %v6667_v25 = vcombine.high %v6636_v16, %v6666_v18  ;;  %v6669_v16 = vcombine.high %v6660_v33, %v6661_v37  ;;  %v6679_v2 = vld [vmem:[#allocation120_spill] sm:$0xff]  ;;  %v6684_v62 = vld [vmem:[#allocation109_spill] sm:$0xff] }
 0x22e   :  { %2901 = vadd.xlane.f32.xlu1 %v2900_v57  ;;  %v3281_v43 = vsel %vm3199_vm14, %v3280_v35, %v3276_v51  ;;  %v2680_v45 = vpop.xlane.xlu0 %2679 }
 0x22f   :  { %v2701_v30 = vpop.xlane.xlu1 %2700  ;;  %v3285_v6 = vrot.slane %v2680_v45, %v5694_v44  ;;  %v2855_v36 = vsel %vm2584_vm0, %v6665_v23, 0.0  ;;  %v2864_v54 = vsel %vm2584_vm0, %v6667_v25, 0.0  ;;  %v2954_v4 = vsel %vm2584_vm0, %v6669_v16, 0.0 }
 0x230   :  { %v3319_v31 = vrot.slane %v2701_v30, %v5595_v61  ;;  %v6680_v23 = vcombine.high %v5028_v39, %v6679_v2  ;;  %v6683_v39 = vcombine.high %v6673_v40, %v6674_v15 }
 0x231   :  { %v3286_v5 = vsel %vm3206_vm15, %v3285_v6, %v3281_v43  ;;  %2940 = vadd.xlane.f32.xlu0 %v2939_v60  ;;  %v6670_v60 = vld [vmem:[#allocation103_spill] sm:$0xff] }
 0x232   :  { %2859 = vadd.xlane.f32.xlu1 %v2858_v55  ;;  %v5802_v22 = vsel %vm3761_vm12, %v3286_v5, %v5712_v34  ;;  %v2686_v32 = vpop.xlane.xlu0 %2685  ;;  %v6672_v5 = vcombine.low %v6670_v60, %v6671_v1  ;;  %vm6682_vm12 = vcmask 851712  }
 0x233   :  { %v2707_v24 = vpop.xlane.xlu1 %2706  ;;  %v3294_v21 = vrot.slane %v2686_v32, %v5503_v47 }
 0x234   :  { %v3329_v55 = vrot.slane %v2707_v24, %v5629_v14  ;;  %v2903_v32 = vsel %vm2584_vm0, %v6672_v5, 0.0 }
 0x235   :  { %v3295_v3 = vsel %vm3108_vm1, %v3294_v21, %v3290_v42  ;;  %2898 = vadd.xlane.f32.xlu0 %v2897_v17  ;;  %v6675_v17 = vcombine.low %v6673_v40, %v6674_v15 }
 0x236   :  { %2949 = vadd.xlane.f32.xlu1 %v2948_v63  ;;  %v3300_v56 = vsel %vm3115_vm2, %v3299_v0, %v3295_v3  ;;  %v2692_v50 = vpop.xlane.xlu0 %2691 }
 0x237   :  { %v2713_v34 = vpop.xlane.xlu1 %2712  ;;  %v3304_v20 = vrot.slane %v2692_v50, %v5554_v38  ;;  %v2912_v3 = vsel %vm2584_vm0, %v6675_v17, 0.0  ;;  %v6677_v50 = vld [vmem:[#allocation106_spill] sm:$0xff] }
 0x238   :  { %v3339_v8 = vrot.slane %v2713_v34, %v5651_v7 }
 0x239   :  { %v3305_v10 = vsel %vm3122_vm3, %v3304_v20, %v3300_v56  ;;  %2856 = vadd.xlane.f32.xlu0 %v2855_v36  ;;  %v6676_v56 = vld [vmem:[#allocation107_spill] sm:$0xff]  ;;  %v2870_v36 = vsel %vm2584_vm0, %v6680_v23, 0.0 }
 0x23a   :  { %2907 = vadd.xlane.f32.xlu1 %v2906_v19  ;;  %v3310_v57 = vsel %vm3129_vm4, %v3309_v46, %v3305_v10  ;;  %v2698_v27 = vpop.xlane.xlu0 %2697  ;;  %v6678_v20 = vcombine.high %v6676_v56, %v6677_v50  ;;  %v6681_v10 = vcombine.high %v6670_v60, %v6671_v1  ;;  %v6688_v60 = vld [vmem:[#allocation117_spill] sm:$0xff] }
 0x23b   :  { %v2719_v35 = vpop.xlane.xlu1 %2718  ;;  %v3314_v11 = vrot.slane %v2698_v27, %v5580_v26 }
 0x23c   :  { %v2861_v46 = vsel %vm2584_vm0, %v6678_v20, 0.0  ;;  %v3349_v28 = vrot.slane %v2719_v35, %v5660_v29 }
 0x23d   :  { %v3315_v51 = vsel %vm3136_vm5, %v3314_v11, %v3310_v57  ;;  %2946 = vadd.xlane.f32.xlu0 %v2945_v52  ;;  %v2951_v57 = vsel %vm2584_vm0, %v6681_v10, 0.0  ;;  %v6685_v52 = vld [vmem:[#allocation108_spill] sm:$0xff] }
 0x23e   :  { %2865 = vadd.xlane.f32.xlu1 %v2864_v54  ;;  %v3320_v45 = vsel %vm3143_vm6, %v3319_v31, %v3315_v51  ;;  %v2704_v6 = vpop.xlane.xlu0 %2703  ;;  %v2960_v54 = vsel %vm2584_vm0, %v6683_v39, 0.0  ;;  %v6686_v51 = vcombine.low %v6684_v62, %v6685_v52  ;;  %v6693_v50 = vcombine.high %v6684_v62, %v6685_v52 }
 0x23f   :  { %v2725_v43 = vpop.xlane.xlu1 %2724  ;;  %v3324_v30 = vrot.slane %v2704_v6, %v5608_v53 }
 0x240   :  { %v3359_v25 = vrot.slane %v2725_v43, %v5679_v13  ;;  %v2957_v20 = vsel %vm2584_vm0, %v6693_v50, 0.0 }
 0x241   :  { %v3325_v42 = vsel %vm3150_vm7, %v3324_v30, %v3320_v45  ;;  %2904 = vadd.xlane.f32.xlu0 %v2903_v32  ;;  %v2909_v45 = vsel %vm2584_vm0, %v6686_v51, 0.0  ;;  %v6690_v32 = vld [vmem:[#allocation119_spill] sm:$0xff] }
 0x242   :  { %2955 = vadd.xlane.f32.xlu1 %v2954_v4  ;;  %v3330_v0 = vsel %vm3157_vm8, %v3329_v55, %v3325_v42  ;;  %v2710_v63 = vpop.xlane.xlu0 %2709  ;;  %v6687_v4 = vld [vmem:[#allocation118_spill] sm:$0xff]  ;;  %v6691_v42 = vld [vmem:[#allocation116_spill] sm:$0xff] }
 0x243   :  { %v2731_v21 = vpop.xlane.xlu1 %2730  ;;  %v3334_v24 = vrot.slane %v2710_v63, %v5635_v9  ;;  %v6689_v1 = vcombine.high %v6687_v4, %v6688_v60 }
 0x244   :  { %v3369_v17 = vrot.slane %v2731_v21, %v5517_v58 }
 0x245   :  { %v3335_v33 = vsel %vm3164_vm9, %v3334_v24, %v3330_v0  ;;  %2862 = vadd.xlane.f32.xlu0 %v2861_v46  ;;  %v2963_v5 = vsel %vm2584_vm0, %v6689_v1, 0.0  ;;  %v6692_v0 = vcombine.high %v6690_v32, %v6691_v42 }
 0x246   :  { %2913 = vadd.xlane.f32.xlu1 %v2912_v3  ;;  %v3340_v59 = vsel %vm3171_vm10, %v3339_v8, %v3335_v33  ;;  %v2716_v19 = vpop.xlane.xlu0 %2715 }
 0x247   :  { %v2737_v37 = vpop.xlane.xlu1 %2736  ;;  %v3344_v34 = vrot.slane %v2716_v19, %v5657_v48  ;;  %v2867_v63 = vsel %vm2584_vm0, %v6692_v0, 0.0 }
 0x248   :  { %v3378_v56 = vrot.slane %v2737_v37, %v5544_v41 }
 0x249   :  { %v3345_v27 = vsel %vm3178_vm11, %v3344_v34, %v3340_v59  ;;  %2952 = vadd.xlane.f32.xlu0 %v2951_v57  ;;  %v6694_v34 = vcombine.low %v6687_v4, %v6688_v60 }
 0x24a   :  { %2871 = vadd.xlane.f32.xlu1 %v2870_v36  ;;  %v3350_v31 = vsel %vm6682_vm12, %v3349_v28, %v3345_v27  ;;  %v2722_v18 = vpop.xlane.xlu0 %2721  ;;  %vm3763_vm12 = vcmask 1042434   ;;  %v6695_v27 = vld [vmem:[#allocation122_spill] sm:$0xff] }
 0x24b   :  { %v2743_v11 = vpop.xlane.xlu1 %2742  ;;  %v3354_v35 = vrot.slane %v2722_v18, %v5671_v49  ;;  %v2915_v37 = vsel %vm2584_vm0, %v6694_v34, 0.0 }
 0x24c   :  { %v3388_v21 = vrot.slane %v2743_v11, %v5572_v12 }
 0x24d   :  { %v3355_v6 = vsel %vm3192_vm13, %v3354_v35, %v3350_v31  ;;  %2910 = vadd.xlane.f32.xlu0 %v2909_v45  ;;  %v6696_v31 = vld [vmem:[#allocation121_spill] sm:$0xff] }
 0x24e   :  { %2961 = vadd.xlane.f32.xlu1 %v2960_v54  ;;  %v3360_v55 = vsel %vm3199_vm14, %v3359_v25, %v3355_v6  ;;  %v2728_v16 = vpop.xlane.xlu0 %2727  ;;  %v6697_v18 = vcombine.low %v6695_v27, %v6696_v31  ;;  %v6698_v51 = vcombine.high %v6695_v27, %v6696_v31 }
 0x24f   :  { %v2749_v30 = vpop.xlane.xlu1 %2748  ;;  %v3364_v43 = vrot.slane %v2728_v16, %v5694_v44 }
 0x250   :  { %v3398_v57 = vrot.slane %v2749_v30, %v5595_v61  ;;  %v2918_v11 = vsel %vm2584_vm0, %v6697_v18, 0.0  ;;  %v2966_v45 = vsel %vm2584_vm0, %v6698_v51, 0.0  ;;  %vm6699_vm0 = vcmask 851712  }
 0x251   :  { %v3365_v24 = vsel %vm3206_vm15, %v3364_v43, %v3360_v55  ;;  %2868 = vadd.xlane.f32.xlu0 %v2867_v63 }
 0x252   :  { %2964 = vadd.xlane.f32.xlu1 %v2963_v5  ;;  %v3764_v8 = vsel %vm3763_vm12, %v3365_v24, %v5802_v22  ;;  %v2734_v15 = vpop.xlane.xlu0 %2733  ;;  %vm3765_vm12 = vcmask 1043459  }
 0x253   :  { %v2755_v40 = vpop.xlane.xlu1 %2754  ;;  %v3373_v3 = vrot.slane %v2734_v15, %v5503_v47 }
 0x254   :  { %v3408_v52 = vrot.slane %v2755_v40, %v5629_v14 }
 0x255   :  { %v3374_v46 = vsel %vm3108_vm1, %v3373_v3, %v3369_v17  ;;  %2958 = vadd.xlane.f32.xlu0 %v2957_v20 }
 0x256   :  { %v3379_v59 = vsel %vm3115_vm2, %v3378_v56, %v3374_v46  ;;  %v2740_v22 = vpop.xlane.xlu0 %2739 }
 0x257   :  { %v2761_v33 = vpop.xlane.xlu1 %2760  ;;  %v3383_v19 = vrot.slane %v2740_v22, %v5554_v38 }
 0x258   :  { %v3418_v4 = vrot.slane %v2761_v33, %v5651_v7 }
 0x259   :  { %v3384_v28 = vsel %vm3122_vm3, %v3383_v19, %v3379_v59  ;;  %2916 = vadd.xlane.f32.xlu0 %v2915_v37 }
 0x25a   :  { %v3389_v23 = vsel %vm3129_vm4, %v3388_v21, %v3384_v28  ;;  %v2746_v36 = vpop.xlane.xlu0 %2745 }
 0x25b   :  { %v2767_v2 = vpop.xlane.xlu1 %2766  ;;  %v3393_v10 = vrot.slane %v2746_v36, %v5580_v26 }
 0x25c   :  { %v3428_v0 = vrot.slane %v2767_v2, %v5660_v29 }
 0x25d   :  { %v3394_v35 = vsel %vm3136_vm5, %v3393_v10, %v3389_v23  ;;  %2919 = vadd.xlane.f32.xlu0 %v2918_v11 }
 0x25e   :  { %v3399_v39 = vsel %vm3143_vm6, %v3398_v57, %v3394_v35  ;;  %v2752_v54 = vpop.xlane.xlu0 %2751 }
 0x25f   :  { %v2773_v25 = vpop.xlane.xlu1 %2772  ;;  %v3403_v62 = vrot.slane %v2752_v54, %v5608_v53 }
 0x260   :  { %v3438_v3 = vrot.slane %v2773_v25, %v5679_v13 }
 0x261   :  { %v3404_v6 = vsel %vm3150_vm7, %v3403_v62, %v3399_v39  ;;  %2967 = vadd.xlane.f32.xlu0 %v2966_v45 }
 0x262   :  { %v3409_v55 = vsel %vm3157_vm8, %v3408_v52, %v3404_v6  ;;  %v2758_v16 = vpop.xlane.xlu0 %2757 }
 0x263   :  { %v2779_v30 = vpop.xlane.xlu1 %2778  ;;  %v3413_v43 = vrot.slane %v2758_v16, %v5635_v9 }
 0x264   :  { %v3448_v34 = vrot.slane %v2779_v30, %v5517_v58 }
 0x265   :  { %v3414_v60 = vsel %vm3164_vm9, %v3413_v43, %v3409_v55 }
 0x266   :  { %v3419_v5 = vsel %vm3171_vm10, %v3418_v4, %v3414_v60  ;;  %v2764_v32 = vpop.xlane.xlu0 %2763 }
 0x267   :  { %v2785_v1 = vpop.xlane.xlu1 %2784  ;;  %v3423_v42 = vrot.slane %v2764_v32, %v5657_v48 }
 0x268   :  { %v3457_v28 = vrot.slane %v2785_v1, %v5544_v41 }
 0x269   :  { %v3424_v63 = vsel %vm3178_vm11, %v3423_v42, %v3419_v5 }
 0x26a   :  { %v3429_v40 = vsel %vm6699_vm0, %v3428_v0, %v3424_v63  ;;  %v2770_v15 = vpop.xlane.xlu0 %2769 }
 0x26b   :  { %v2791_v24 = vpop.xlane.xlu1 %2790  ;;  %v3433_v17 = vrot.slane %v2770_v15, %v5671_v49 }
 0x26c   :  { %v3467_v27 = vrot.slane %v2791_v24, %v5572_v12 }
 0x26d   :  { %v3434_v56 = vsel %vm3192_vm13, %v3433_v17, %v3429_v40 }
 0x26e   :  { %v3439_v20 = vsel %vm3199_vm14, %v3438_v3, %v3434_v56  ;;  %v2776_v46 = vpop.xlane.xlu0 %2775 }
 0x26f   :  { %v2797_v50 = vpop.xlane.xlu1 %2796  ;;  %v3443_v33 = vrot.slane %v2776_v46, %v5694_v44 }
 0x270   :  { %v3477_v25 = vrot.slane %v2797_v50, %v5595_v61 }
 0x271   :  { %v3444_v59 = vsel %vm3206_vm15, %v3443_v33, %v3439_v20 }
 0x272   :  { %v3766_v22 = vsel %vm3765_vm12, %v3444_v59, %v3764_v8  ;;  %v2782_v21 = vpop.xlane.xlu0 %2781  ;;  %vm3767_vm12 = vcmask 1044484  }
 0x273   :  { %v2803_v19 = vpop.xlane.xlu1 %2802  ;;  %v3452_v37 = vrot.slane %v2782_v21, %v5503_v47 }
 0x274   :  { %v3487_v45 = vrot.slane %v2803_v19, %v5629_v14 }
 0x275   :  { %v3453_v2 = vsel %vm3108_vm1, %v3452_v37, %v3448_v34 }
 0x276   :  { %v3458_v36 = vsel %vm3115_vm2, %v3457_v28, %v3453_v2  ;;  %v2788_v10 = vpop.xlane.xlu0 %2787 }
 0x277   :  { %v2809_v23 = vpop.xlane.xlu1 %2808  ;;  %v3462_v57 = vrot.slane %v2788_v10, %v5554_v38 }
 0x278   :  { %v3497_v4 = vrot.slane %v2809_v23, %v5651_v7 }
 0x279   :  { %v3463_v8 = vsel %vm3122_vm3, %v3462_v57, %v3458_v36 }
 0x27a   :  { %v3468_v18 = vsel %vm3129_vm4, %v3467_v27, %v3463_v8  ;;  %v2794_v11 = vpop.xlane.xlu0 %2793 }
 0x27b   :  { %v2815_v31 = vpop.xlane.xlu1 %2814  ;;  %v3472_v35 = vrot.slane %v2794_v11, %v5580_v26 }
 0x27c   :  { %v3507_v0 = vrot.slane %v2815_v31, %v5660_v29 }
 0x27d   :  { %v3473_v39 = vsel %vm3136_vm5, %v3472_v35, %v3468_v18 }
 0x27e   :  { %v3478_v62 = vsel %vm3143_vm6, %v3477_v25, %v3473_v39  ;;  %v2800_v52 = vpop.xlane.xlu0 %2799 }
 0x27f   :  { %v2821_v54 = vpop.xlane.xlu1 %2820  ;;  %v3482_v51 = vrot.slane %v2800_v52, %v5608_v53 }
 0x280   :  { %v3517_v3 = vrot.slane %v2821_v54, %v5679_v13 }
 0x281   :  { %v3483_v6 = vsel %vm3150_vm7, %v3482_v51, %v3478_v62 }
 0x282   :  { %v3488_v55 = vsel %vm3157_vm8, %v3487_v45, %v3483_v6  ;;  %v2806_v16 = vpop.xlane.xlu0 %2805 }
 0x283   :  { %v2827_v30 = vpop.xlane.xlu1 %2826  ;;  %v3492_v43 = vrot.slane %v2806_v16, %v5635_v9 }
 0x284   :  { %v3527_v37 = vrot.slane %v2827_v30, %v5517_v58 }
 0x285   :  { %v3493_v60 = vsel %vm3164_vm9, %v3492_v43, %v3488_v55 }
 0x286   :  { %v3498_v5 = vsel %vm3171_vm10, %v3497_v4, %v3493_v60  ;;  %v2812_v32 = vpop.xlane.xlu0 %2811 }
 0x287   :  { %v2833_v1 = vpop.xlane.xlu1 %2832  ;;  %v3502_v42 = vrot.slane %v2812_v32, %v5657_v48 }
 0x288   :  { %v3536_v2 = vrot.slane %v2833_v1, %v5544_v41 }
 0x289   :  { %v3503_v63 = vsel %vm3178_vm11, %v3502_v42, %v3498_v5 }
 0x28a   :  { %v3508_v40 = vsel %vm6699_vm0, %v3507_v0, %v3503_v63  ;;  %v2818_v15 = vpop.xlane.xlu0 %2817 }
 0x28b   :  { %v2878_v24 = vpop.xlane.xlu1 %2877  ;;  %v3512_v17 = vrot.slane %v2818_v15, %v5671_v49 }
 0x28c   :  { %v3610_v27 = vrot.slane %v2878_v24, %v5503_v47 }
 0x28d   :  { %v3513_v56 = vsel %vm3192_vm13, %v3512_v17, %v3508_v40 }
 0x28e   :  { %v3518_v20 = vsel %vm3199_vm14, %v3517_v3, %v3513_v56  ;;  %v2824_v46 = vpop.xlane.xlu0 %2823 }
 0x28f   :  { %v2881_v50 = vpop.xlane.xlu1 %2880  ;;  %v3522_v33 = vrot.slane %v2824_v46, %v5694_v44 }
 0x290   :  { %v3615_v8 = vrot.slane %v2881_v50, %v5544_v41 }
 0x291   :  { %v3523_v59 = vsel %vm3206_vm15, %v3522_v33, %v3518_v20 }
 0x292   :  { %v5975_v19 = vsel %vm3767_vm12, %v3523_v59, %v3766_v22  ;;  %v2830_v34 = vpop.xlane.xlu0 %2829 }
 0x293   :  { %v2926_v21 = vpop.xlane.xlu1 %2925  ;;  %v3531_v28 = vrot.slane %v2830_v34, %v5503_v47 }
 0x295   :  { %v3532_v23 = vsel %vm3108_vm1, %v3531_v28, %v3527_v37 }
 0x296   :  { %v2875_v10 = vpop.xlane.xlu0 %2874  ;;  %v3537_v57 = vsel %vm3115_vm2, %v3536_v2, %v3532_v23 }
 0x297   :  { %v5981_v36 = vpop.xlane.xlu1 %2883  ;;  %v3606_v22 = vrot.slane %v2875_v10, %v5517_v58 }
 0x299   :  { %v3611_v31 = vsel %vm3108_vm1, %v3610_v27, %v3606_v22  ;;  %v3689_v22 = vrot.slane %v2926_v21, %v5503_v47 }
 0x29a   :  { %v3616_v18 = vsel %vm3115_vm2, %v3615_v8, %v3611_v31  ;;  %v2836_v35 = vpop.xlane.xlu0 %2835 }
 0x29b   :  { %v2842_v11 = vpop.xlane.xlu1 %2841  ;;  %v3541_v25 = vrot.slane %v2836_v35, %v5554_v38 }
 0x29c   :  { %v3551_v33 = vrot.slane %v2842_v11, %v5580_v26 }
 0x29d   :  { %v3542_v39 = vsel %vm3122_vm3, %v3541_v25, %v3537_v57 }
 0x29e   :  { %v2923_v62 = vpop.xlane.xlu0 %2922 }
 0x29f   :  { %v2932_v54 = vpop.xlane.xlu1 %2931  ;;  %v3685_v37 = vrot.slane %v2923_v62, %v5517_v58  ;;  %v3620_v58 = vrot.slane %v5981_v36, %v5554_v38 }
 0x2a0   :  { %v3699_v21 = vrot.slane %v2932_v54, %v5554_v38 }
 0x2a1   :  { %v3690_v11 = vsel %vm3108_vm1, %v3689_v22, %v3685_v37  ;;  %vm6700_vm1 = vmmov %vm6699_vm0 }
 0x2a2   :  { %v2839_v51 = vpop.xlane.xlu0 %2838 }
 0x2a3   :  { %v5991_v52 = vpop.xlane.xlu1 %2889  ;;  %v3546_v3 = vrot.slane %v2839_v51, %v5572_v12  ;;  %v3621_v51 = vsel %vm3122_vm3, %v3620_v58, %v3616_v18 }
 0x2a5   :  { %v3547_v20 = vsel %vm3129_vm4, %v3546_v3, %v3542_v39 }
 0x2a6   :  { %v2929_v6 = vpop.xlane.xlu0 %2928  ;;  %v3552_v34 = vsel %vm3136_vm5, %v3551_v33, %v3547_v20 }
 0x2a7   :  { %v2848_v45 = vpop.xlane.xlu1 %2847  ;;  %v3694_v57 = vrot.slane %v2929_v6, %v5544_v41 }
 0x2a8   :  { %v3561_v10 = vrot.slane %v2848_v45, %v5608_v53 }
 0x2a9   :  { %v3695_v39 = vsel %vm3115_vm2, %v3694_v57, %v3690_v11  ;;  %vm3769_vm2 = vcmask 1045509  }
 0x2aa   :  { %v2887_v55 = vpop.xlane.xlu0 %2886 }
 0x2ab   :  { %v5993_v30 = vpop.xlane.xlu1 %2937  ;;  %v3625_v8 = vrot.slane %v2887_v55, %v5572_v12 }
 0x2ad   :  { %v3626_v36 = vsel %vm3129_vm4, %v3625_v8, %v3621_v51 }
 0x2ae   :  { %v2845_v43 = vpop.xlane.xlu0 %2844 }
 0x2af   :  { %v5995_v16 = vpop.xlane.xlu1 %2895  ;;  %v3556_v46 = vrot.slane %v2845_v43, %v5595_v61  ;;  %v3630_v43 = vrot.slane %v5991_v52, %v5580_v26 }
 0x2b1   :  { %v3557_v28 = vsel %vm3143_vm6, %v3556_v46, %v3552_v34  ;;  %v3640_v46 = vrot.slane %v5995_v16, %v5608_v53 }
 0x2b2   :  { %v2935_v60 = vpop.xlane.xlu0 %2934  ;;  %v3562_v31 = vsel %vm3150_vm7, %v3561_v10, %v3557_v28 }
 0x2b3   :  { %v2854_v4 = vpop.xlane.xlu1 %2853  ;;  %v3704_v62 = vrot.slane %v2935_v60, %v5572_v12 }
 0x2b4   :  { %v3571_v41 = vrot.slane %v2854_v4, %v5635_v9  ;;  %v3700_v4 = vsel %vm3122_vm3, %v3699_v21, %v3695_v39  ;;  %vm6701_vm3 = vmmov %vm6699_vm0 }
 0x2b5   :  { %v3705_v38 = vsel %vm3129_vm4, %v3704_v62, %v3700_v4  ;;  %vm6702_vm4 = vmmov %vm6699_vm0 }
 0x2b6   :  { %v2893_v5 = vpop.xlane.xlu0 %2892 }
 0x2b7   :  { %v5997_v1 = vpop.xlane.xlu1 %2943  ;;  %v3635_v6 = vrot.slane %v2893_v5, %v5595_v61  ;;  %v3709_v5 = vrot.slane %v5993_v30, %v5580_v26 }
 0x2b9   :  { %v3710_v33 = vsel %vm3136_vm5, %v3709_v5, %v3705_v38 }
 0x2ba   :  { %v2851_v42 = vpop.xlane.xlu0 %2850 }
 0x2bb   :  { %v5999_v32 = vpop.xlane.xlu1 %2901  ;;  %v3566_v2 = vrot.slane %v2851_v42, %v5629_v14 }
 0x2bd   :  { %v3567_v35 = vsel %vm3157_vm8, %v3566_v2, %v3562_v31 }
 0x2be   :  { %v2941_v63 = vpop.xlane.xlu0 %2940  ;;  %v3572_v55 = vsel %vm3164_vm9, %v3571_v41, %v3567_v35 }
 0x2bf   :  { %v2860_v0 = vpop.xlane.xlu1 %2859  ;;  %v3714_v54 = vrot.slane %v2941_v63, %v5595_v61 }
 0x2c0   :  { %v3581_v18 = vrot.slane %v2860_v0, %v5657_v48 }
 0x2c1   :  { %v3715_v63 = vsel %vm3143_vm6, %v3714_v54, %v3710_v33 }
 0x2c2   :  { %v2899_v40 = vpop.xlane.xlu0 %2898 }
 0x2c3   :  { %v6001_v24 = vpop.xlane.xlu1 %2949  ;;  %v3645_v3 = vrot.slane %v2899_v40, %v5629_v14  ;;  %v3719_v40 = vrot.slane %v5997_v1, %v5608_v53 }
 0x2c6   :  { %v2857_v17 = vpop.xlane.xlu0 %2856 }
 0x2c7   :  { %v6003_v15 = vpop.xlane.xlu1 %2907  ;;  %v3576_v25 = vrot.slane %v2857_v17, %v5651_v7  ;;  %v3631_v17 = vsel %vm3136_vm5, %v3630_v43, %v3626_v36  ;;  %vm3771_vm5 = vcmask 1046534  }
 0x2c8   :  { %v3636_v52 = vsel %vm3143_vm6, %v3635_v6, %v3631_v17  ;;  %v3660_v11 = vrot.slane %v6003_v15, %v5657_v48  ;;  %vm3773_vm6 = vcmask 1047559  }
 0x2c9   :  { %v3577_v12 = vsel %vm3171_vm10, %v3576_v25, %v3572_v55  ;;  %v3641_v37 = vsel %vm3150_vm7, %v3640_v46, %v3636_v52 }
 0x2ca   :  { %v6006_v56 = vpop.xlane.xlu0 %2946  ;;  %v3582_v20 = vsel %vm3178_vm11, %v3581_v18, %v3577_v12  ;;  %v3646_v28 = vsel %vm3157_vm8, %v3645_v3, %v3641_v37 }
 0x2cb   :  { %v2866_v50 = vpop.xlane.xlu1 %2865  ;;  %v3724_v30 = vrot.slane %v6006_v56, %v5629_v14  ;;  %v3650_v14 = vrot.slane %v5999_v32, %v5635_v9  ;;  %v3720_v56 = vsel %vm3150_vm7, %v3719_v40, %v3715_v63 }
 0x2cc   :  { %v3591_v26 = vrot.slane %v2866_v50, %v5671_v49 }
 0x2cd   :  { %v3725_v1 = vsel %vm3157_vm8, %v3724_v30, %v3720_v56  ;;  %v3651_v8 = vsel %vm3164_vm9, %v3650_v14, %v3646_v28 }
 0x2ce   :  { %v6011_v59 = vpop.xlane.xlu0 %2904 }
 0x2cf   :  { %v6017_v23 = vpop.xlane.xlu1 %2955  ;;  %v3655_v2 = vrot.slane %v6011_v59, %v5651_v7  ;;  %v3729_v59 = vrot.slane %v6001_v24, %v5635_v9 }
 0x2d0   :  { %v3739_v9 = vrot.slane %v6017_v23, %v5657_v48 }
 0x2d1   :  { %v3656_v32 = vsel %vm3171_vm10, %v3655_v2, %v3651_v8  ;;  %v3730_v35 = vsel %vm3164_vm9, %v3729_v59, %v3725_v1 }
 0x2d2   :  { %v2863_v27 = vpop.xlane.xlu0 %2862 }
 0x2d3   :  { %v6034_v45 = vpop.xlane.xlu1 %2913  ;;  %v3586_v60 = vrot.slane %v2863_v27, %v5660_v29 }
 0x2d4   :  { %v3670_v15 = vrot.slane %v6034_v45, %v5671_v49 }
 0x2d5   :  { %v3587_v0 = vsel %vm6700_vm1, %v3586_v60, %v3582_v20 }
 0x2d6   :  { %v2953_v47 = vpop.xlane.xlu0 %2952  ;;  %v3592_v50 = vsel %vm3192_vm13, %v3591_v26, %v3587_v0 }
 0x2d7   :  { %v2872_v61 = vpop.xlane.xlu1 %2871  ;;  %v3734_v57 = vrot.slane %v2953_v47, %v5651_v7 }
 0x2d8   :  { %v3601_v10 = vrot.slane %v2872_v61, %v5694_v44 }
 0x2d9   :  { %v3735_v25 = vsel %vm3171_vm10, %v3734_v57, %v3730_v35 }
 0x2da   :  { %v2911_v42 = vpop.xlane.xlu0 %2910  ;;  %v3740_v47 = vsel %vm3178_vm11, %v3739_v9, %v3735_v25 }
 0x2db   :  { %v3665_v58 = vrot.slane %v2911_v42, %v5660_v29  ;;  %v2962_v7 = vpop.xlane.xlu1 %2961 }
 0x2de   :  { %v2869_v34 = vpop.xlane.xlu0 %2868 }
 0x2df   :  { %v3596_v16 = vrot.slane %v2869_v34, %v5679_v13  ;;  %v2965_v36 = vpop.xlane.xlu1 %2964 }
 0x2e0   :  { %v3754_v45 = vrot.slane %v2965_v36, %v5679_v13 }
 0x2e1   :  { %v3597_v53 = vsel %vm3199_vm14, %v3596_v16, %v3592_v50 }
 0x2e2   :  { %v3602_v27 = vsel %vm3206_vm15, %v3601_v10, %v3597_v53  ;;  %v2959_v22 = vpop.xlane.xlu0 %2958 }
 0x2e3   :  { %v3770_v31 = vsel %vm3769_vm2, %v3602_v27, %v5975_v19  ;;  %v3744_v39 = vrot.slane %v2959_v22, %v5660_v29  ;;  %v3661_v19 = vsel %vm3178_vm11, %v3660_v11, %v3656_v32  ;;  %v3749_v29 = vrot.slane %v2962_v7, %v5671_v49 }
 0x2e4   :  { %v3666_v24 = vsel %vm6701_vm3, %v3665_v58, %v3661_v19 }
 0x2e5   :  { %v3745_v21 = vsel %vm6702_vm4, %v3744_v39, %v3740_v47  ;;  %v3671_v6 = vsel %vm3192_vm13, %v3670_v15, %v3666_v24 }
 0x2e6   :  { %v2917_v41 = vpop.xlane.xlu0 %2916  ;;  %v3750_v55 = vsel %vm3192_vm13, %v3749_v29, %v3745_v21 }
 0x2e7   :  { %v3675_v62 = vrot.slane %v2917_v41, %v5679_v13  ;;  %v3755_v60 = vsel %vm3199_vm14, %v3754_v45, %v3750_v55 }
 0x2e9   :  { %v3676_v23 = vsel %vm3199_vm14, %v3675_v62, %v3671_v6 }
 0x2ea   :  { %v2920_v51 = vpop.xlane.xlu0 %2919 }
 0x2eb   :  { %v3680_v48 = vrot.slane %v2920_v51, %v5694_v44 }
 0x2ed   :  { %v3681_v43 = vsel %vm3206_vm15, %v3680_v48, %v3676_v23 }
 0x2ee   :  { %v2968_v4 = vpop.xlane.xlu0 %2967  ;;  %v3772_v12 = vsel %vm3771_vm5, %v3681_v43, %v3770_v31 }
 0x2ef   :  { %v3759_v49 = vrot.slane %v2968_v4, %v5694_v44 }
 0x2f1   :  { %v3760_v38 = vsel %vm3206_vm15, %v3759_v49, %v3755_v60 }
 0x2f2   :  { %v3774_v18 = vsel %vm3773_vm6, %v3760_v38, %v3772_v12 }
 0x2f3   :  { %3776 = vst [vmem:[#allocation2] sm:$0xff] %v3774_v18 }
 0x2f4   :  { %3868 = shalt.err (!%p3865_p4)
}
 0x2f5   :  { %s3869_s22 = scalar_lea.hbm %s6121_s2, 128 }
 0x2f6   :  { %p3870_p5 = scmp.ne.s32.totalorder %s6121_s2, %s3869_s22  ;;  %p3873_p6 = scmp.lt.u32.totalorder %s3869_s22, %s6121_s2 }
 0x2f8   :  { %p3875_p7 = pnand %p3873_p6, %p3870_p5 }
 0x2fa   :  { %3878 = shalt.err (!%p3875_p7)
}
 0x2fb   :  { %3786 = dma.vmem_to_hbm [thread:$0]  %s3784_s12, 128, %s6121_s2, [#allocation3]  }
 0x2fc   :  { %3879 = dma.done.wait [#allocation3], 128  }
 0x2fd   :  { %3880 = vsyncadd [#allocation3], 4294967168 }
 0x2fe   :  { %3790 = vsyncpa [#allocation3], 1 }

// kernel: _forward.1
= control target key start
LH: loop header
LB: loop body
LE: loop exit
PB: predicated region body
PF: predicated region fallthrough
CT: control target
= control target key end

     0   :  { %v16_v0 = vlaneseq  ;;  %s65_s2 = inlined_call_operand.vmem [shape: f32[2,128], index: 2, kind: input, shape index: {}]   ;;  %s66_s0 = inlined_call_operand.vmem [shape: f32[8,128], index: 0, kind: input, shape index: {}]   ;;  %s67_s1 = inlined_call_operand.vmem [shape: f32[8,128], index: 1, kind: input, shape index: {}]   ;;  %s68_s3 = inlined_call_operand.vmem [shape: f32[8,128], index: 3, kind: output, shape index: {}]  }
   0x1   :  { %v14_v2 = vld [vmem:[%s65_s2] sm:$0x3] }
   0x2   :  { %v17_v1 = vshrl.u32 %v16_v0, 7  ;;  %v15_v5 = vld [vmem:[%s66_s0] sm:$0xff] }
   0x3   :  { %v21_v6 = vld [vmem:[%s67_s1] sm:$0xff] }
   0x4   :  { %v18_v3 = vsub.s32 0, %v17_v1  ;;  %v24_v4 = vsub.s32 1, %v17_v1 }
   0x6   :  { %v19_v7 = vrot.slane %v14_v2, %v18_v3  ;;  %v25_v8 = vrot.slane %v14_v2, %v24_v4 }
   0x8   :  { %v20_v9 = vmul.f32 %v19_v7, %v15_v5  ;;  %v26_v10 = vmul.f32 %v25_v8, %v21_v6 }
   0xa   :  { %v27_v11 = vadd.f32 %v26_v10, %v20_v9 }
   0xc   :  { %28 = vst [vmem:[%s68_s3] sm:$0xff] %v27_v11 }

</bundles_post_ra>
